<compile_context>
chip_gen: v6e
topology: v6e:2x2x1
jax: 0.10.0
libtpu: 0.0.40
codegen_flags: <defaults>
</compile_context>

<pallas_src>
import functools

import jax
import jax.numpy as jnp
from jax.experimental import pallas as pl
from jax.experimental.pallas import tpu as pltpu


def _round_up(n, m):
    return ((n + m - 1) // m) * m


def _pad_to(a, shape):
    return jnp.pad(a, [(0, s - d) for d, s in zip(a.shape, shape)])


def _vmem_capacity_bytes():
    """Physical VMEM of the current chip; conservative (v7x) fallback."""
    try:
        info = pltpu.get_tpu_info()
        for name in ("vmem_capacity_bytes", "vmem_size_bytes", "vmem_bytes"):
            v = getattr(info, name, None)
            if v:
                return int(v)
    except Exception:
        pass
    return 64 * 1024 * 1024


def _pick_time_tile(T, block_b, F, elem_bytes, budget_bytes):
    """Largest time tile whose single x buffer fits `budget_bytes`.

    Short sequences use the whole time axis (block == full extent, always
    legal).  Otherwise the tile is a multiple of 16 rows (safe sublane count
    for any dtype); a ragged last chunk is masked inside the kernel, so T
    never has to divide the tile and x is never padded/copied."""
    denom = max(1, block_b * F * elem_bytes)
    rows = budget_bytes // denom
    if T <= max(rows, 16):
        return T
    return max(16, int(rows // 16) * 16)


def audio_classifier_kernel(x_ref, wb_ref, bb_ref, w1_ref, b1_ref,
                            w2_ref, b2_ref, out_ref, acc_ref,
                            *, inv_t, t_total, tile_t, mask_time):
    ti = pl.program_id(1)

    @pl.when(ti == 0)
    def _():
        acc_ref[...] = jnp.zeros_like(acc_ref)

    # --- pool-before-project: accumulate the time-sum of this x chunk ------
    xb = x_ref[...].astype(jnp.float32)            # (block_b, tile_t, F)
    if mask_time:
        # Last chunk may extend past T (ragged grid); zero the garbage rows.
        t_idx = jax.lax.broadcasted_iota(jnp.int32, xb.shape, 1) + ti * tile_t
        xb = jnp.where(t_idx < t_total, xb, 0.0)
    acc_ref[...] += jnp.sum(xb, axis=1)            # (block_b, F) f32

    # --- projection + classifier head: runs once, on the last time chunk ---
    @pl.when(ti == pl.num_programs(1) - 1)
    def _():
        # TODO(synk): valid only because the synthetic base model is linear
        # (mean_t(x) @ Wb == mean_t(x @ Wb)); a real transformer base model
        # would need the per-frame path restored.
        pooled = acc_ref[...] * inv_t                                # (bb, F)
        emb = jnp.dot(pooled, wb_ref[...],
                      preferred_element_type=jnp.float32) + bb_ref[...]
        h = jnp.dot(emb, w1_ref[...],
                    preferred_element_type=jnp.float32) + b1_ref[...]
        h = jnp.maximum(h, 0.0)        # ReLU; Dropout(0.1) = identity (eval)
        out_ref[...] = jnp.dot(h, w2_ref[...],
                               preferred_element_type=jnp.float32) + b2_ref[...]


def audio_classifier_forward(x, params):
    B, T, F = x.shape
    H = params["wb"].shape[1]
    HEAD = params["w1"].shape[1]
    C = params["w2"].shape[1]

    # Lane-dense padding for the (small) weight matrices / output store.
    H_pad = _round_up(H, 128)
    HEAD_pad = _round_up(HEAD, 128)
    C_pad = _round_up(C, 128)

    # Batch blocking: >=2 blocks when possible so the "parallel" batch axis
    # can shard across v7x's two TensorCores; small batches stay whole
    # (block == full batch extent is always a legal block shape).
    if B >= 16:
        block_b = min(128, _round_up((B + 1) // 2, 8))
    else:
        block_b = B
    grid_b = pl.cdiv(B, block_b)
    out_rows = grid_b * block_b          # output allocation covers ragged tail

    # VMEM budgets per generation (v7x: 64 MiB physical; v5e/v6e: 128 MiB).
    cap = _vmem_capacity_bytes()
    vmem_limit = int(min((cap * 3) // 4, 96 * 1024 * 1024))
    weight_bytes = 4 * (F * H_pad + H_pad + H_pad * HEAD_pad + HEAD_pad
                        + HEAD_pad * C_pad + C_pad)
    reserve = 2 * weight_bytes + 4 * block_b * (F + C_pad) + (2 << 20)
    x_buf_budget = max(1 << 20, (vmem_limit - reserve) // 2)  # per x buffer

    elem_bytes = jnp.dtype(x.dtype).itemsize
    tile_t = _pick_time_tile(T, block_b, F, elem_bytes, x_buf_budget)
    grid_t = pl.cdiv(T, tile_t)
    mask_time = (T % tile_t) != 0

    # Only the small weights/biases get padded + cast (f32); x is untouched.
    wb_p = _pad_to(params["wb"].astype(jnp.float32), (F, H_pad))
    bb_p = _pad_to(params["bb"].astype(jnp.float32), (1, H_pad))
    w1_p = _pad_to(params["w1"].astype(jnp.float32), (H_pad, HEAD_pad))
    b1_p = _pad_to(params["b1"].astype(jnp.float32), (1, HEAD_pad))
    w2_p = _pad_to(params["w2"].astype(jnp.float32), (HEAD_pad, C_pad))
    b2_p = _pad_to(params["b2"].astype(jnp.float32), (1, C_pad))

    kernel = functools.partial(audio_classifier_kernel, inv_t=1.0 / T,
                               t_total=T, tile_t=tile_t, mask_time=mask_time)

    def run(weight_buffers):
        def const_spec(shape):
            n = len(shape)
            idx = lambda bi, ti: (0,) * n
            if weight_buffers is None:
                return pl.BlockSpec(shape, idx)
            # Grid-invariant operands: single-buffer them to free VMEM.
            return pl.BlockSpec(shape, idx,
                                pipeline_mode=pl.Buffered(weight_buffers))

        return pl.pallas_call(
            kernel,
            out_shape=jax.ShapeDtypeStruct((out_rows, C_pad), jnp.float32),
            grid_spec=pltpu.PrefetchScalarGridSpec(
                num_scalar_prefetch=0,
                grid=(grid_b, grid_t),
                in_specs=[
                    # streamed x chunks (double-buffered by Pallas)
                    pl.BlockSpec((block_b, tile_t, F),
                                 lambda bi, ti: (bi, ti, 0)),
                    # VMEM-resident weights / biases
                    const_spec((F, H_pad)),
                    const_spec((1, H_pad)),
                    const_spec((H_pad, HEAD_pad)),
                    const_spec((1, HEAD_pad)),
                    const_spec((HEAD_pad, C_pad)),
                    const_spec((1, C_pad)),
                ],
                out_specs=pl.BlockSpec((block_b, C_pad),
                                       lambda bi, ti: (bi, 0)),
                scratch_shapes=[pltpu.VMEM((block_b, F), jnp.float32)],
            ),
            compiler_params=pltpu.CompilerParams(
                dimension_semantics=("parallel", "arbitrary"),
                vmem_limit_bytes=vmem_limit,
            ),
        )(x, wb_p, bb_p, w1_p, b1_p, w2_p, b2_p)

    try:
        out_pad = run(1)
    except Exception:
        # Fallback if this JAX build rejects pipeline_mode / Buffered(1).
        out_pad = run(None)

    return out_pad[:B, :C]


def make_params(key, feat, hidden, num_classes, head=512):
    ks = jax.random.split(key, 6)

    def init(k, shape, fan_in):
        return jax.random.normal(k, shape, jnp.float32) / jnp.sqrt(fan_in)

    return dict(
        wb=init(ks[0], (feat, hidden), feat),
        bb=0.1 * jax.random.normal(ks[1], (1, hidden), jnp.float32),
        w1=init(ks[2], (hidden, head), hidden),
        b1=0.1 * jax.random.normal(ks[3], (1, head), jnp.float32),
        w2=init(ks[4], (head, num_classes), head),
        b2=0.1 * jax.random.normal(ks[5], (1, num_classes), jnp.float32),
    )


def reference_forward(x, params):
    # Pure-f32 reference matching the PyTorch module semantics.
    hid = jnp.einsum("btf,fh->bth", x, params["wb"]) + params["bb"][0]
    emb = hid.mean(axis=1)
    h = jnp.maximum(emb @ params["w1"] + params["b1"][0], 0.0)
    return h @ params["w2"] + params["b2"][0]


if __name__ == "__main__":
    B, T, F, H, num_classes = 2, 8, 64, 32, 10
    key = jax.random.PRNGKey(0)
    kx, kp = jax.random.split(key)
    x = jax.random.normal(kx, (B, T, F), jnp.float32)
    params = make_params(kp, F, H, num_classes)

    out = audio_classifier_forward(x, params)
    out = jax.block_until_ready(out)

    ref = reference_forward(x, params)
    assert out.shape == (B, num_classes)
    max_err = float(jnp.max(jnp.abs(out - ref)))
    assert jnp.allclose(out, ref, atol=3e-2, rtol=3e-2), max_err
    print("KERNEL_OK")
</pallas_src>

<mosaic_0001>
module attributes {stable_mosaic.version = 11 : i64} {
  func.func @audio_classifier_kernel(%arg0: i32, %arg1: i32, %arg2: memref<2x8x64xf32, #tpu.memory_space<vmem>>, %arg3: memref<64x128xf32, #tpu.memory_space<vmem>>, %arg4: memref<1x128xf32, #tpu.memory_space<vmem>>, %arg5: memref<128x512xf32, #tpu.memory_space<vmem>>, %arg6: memref<1x512xf32, #tpu.memory_space<vmem>>, %arg7: memref<512x128xf32, #tpu.memory_space<vmem>>, %arg8: memref<1x128xf32, #tpu.memory_space<vmem>>, %arg9: memref<2x128xf32, #tpu.memory_space<vmem>>, %arg10: memref<2x64xf32, #tpu.memory_space<vmem>>) attributes {dimension_semantics = [#tpu.dimension_semantics<parallel>, #tpu.dimension_semantics<arbitrary>], iteration_bounds = array<i64: 1, 1>, scalar_prefetch = 0 : i64, scratch_operands = 1 : i64, tpu.core_type = #tpu.core_type<tc>, window_params = [{transform_indices = @transform_0, window_bounds = array<i64: 2, 8, 64>}, {pipeline_mode = #tpu.pipeline_mode<synchronous>, transform_indices = @transform_1, window_bounds = array<i64: 64, 128>}, {pipeline_mode = #tpu.pipeline_mode<synchronous>, transform_indices = @transform_2, window_bounds = array<i64: 1, 128>}, {pipeline_mode = #tpu.pipeline_mode<synchronous>, transform_indices = @transform_3, window_bounds = array<i64: 128, 512>}, {pipeline_mode = #tpu.pipeline_mode<synchronous>, transform_indices = @transform_4, window_bounds = array<i64: 1, 512>}, {pipeline_mode = #tpu.pipeline_mode<synchronous>, transform_indices = @transform_5, window_bounds = array<i64: 512, 128>}, {pipeline_mode = #tpu.pipeline_mode<synchronous>, transform_indices = @transform_6, window_bounds = array<i64: 1, 128>}, {transform_indices = @transform_7, window_bounds = array<i64: 2, 128>}]} {
    %c0_i32 = arith.constant 0 : i32
    %0 = arith.cmpi eq, %arg1, %c0_i32 : i32
    %1 = arith.extui %0 : i1 to i32
    %c0_i32_0 = arith.constant 0 : i32
    %2 = arith.cmpi ne, %1, %c0_i32_0 : i32
    scf.if %2 {
      %cst_9 = arith.constant 0.000000e+00 : f32
      %11 = vector.broadcast %cst_9 : f32 to vector<2x64xf32>
      %c0_10 = arith.constant 0 : index
      %c0_11 = arith.constant 0 : index
      %12 = vector.load %arg10[%c0_10, %c0_11] : memref<2x64xf32, #tpu.memory_space<vmem>>, vector<2x64xf32>
      tpu.vector_store %arg10[%c0_10, %c0_11], %11 {strides = array<i32>} : memref<2x64xf32, #tpu.memory_space<vmem>>, vector<2x64xf32>,
    } else {
    }
    %c0 = arith.constant 0 : index
    %c0_1 = arith.constant 0 : index
    %c0_2 = arith.constant 0 : index
    %3 = vector.load %arg2[%c0, %c0_1, %c0_2] : memref<2x8x64xf32, #tpu.memory_space<vmem>>, vector<2x8x64xf32>
    %c0_3 = arith.constant 0 : index
    %c0_4 = arith.constant 0 : index
    %4 = vector.load %arg10[%c0_3, %c0_4] : memref<2x64xf32, #tpu.memory_space<vmem>>, vector<2x64xf32>
    %cst = arith.constant dense<0.000000e+00> : vector<2x64xf32>
    %5 = vector.multi_reduction <add>, %3, %cst [1] : vector<2x8x64xf32> to vector<2x64xf32>
    %6 = arith.addf %4, %5 : vector<2x64xf32>
    %c0_5 = arith.constant 0 : index
    %c0_6 = arith.constant 0 : index
    %7 = vector.load %arg10[%c0_5, %c0_6] : memref<2x64xf32, #tpu.memory_space<vmem>>, vector<2x64xf32>
    tpu.vector_store %arg10[%c0_5, %c0_6], %6 {strides = array<i32>} : memref<2x64xf32, #tpu.memory_space<vmem>>, vector<2x64xf32>,
    %c0_i32_7 = arith.constant 0 : i32
    %8 = arith.cmpi eq, %arg1, %c0_i32_7 : i32
    %9 = arith.extui %8 : i1 to i32
    %c0_i32_8 = arith.constant 0 : i32
    %10 = arith.cmpi ne, %9, %c0_i32_8 : i32
    scf.if %10 {
      %c0_9 = arith.constant 0 : index
      %c0_10 = arith.constant 0 : index
      %11 = vector.load %arg10[%c0_9, %c0_10] : memref<2x64xf32, #tpu.memory_space<vmem>>, vector<2x64xf32>
      %cst_11 = arith.constant 1.250000e-01 : f32
      %12 = vector.broadcast %cst_11 : f32 to vector<2x64xf32>
      %13 = arith.mulf %11, %12 : vector<2x64xf32>
      %c0_12 = arith.constant 0 : index
      %c0_13 = arith.constant 0 : index
      %14 = vector.load %arg3[%c0_12, %c0_13] : memref<64x128xf32, #tpu.memory_space<vmem>>, vector<64x128xf32>
      %cst_14 = arith.constant dense<0.000000e+00> : vector<2x128xf32>
      %15 = tpu.matmul %13, %14, %cst_14 {dimension_numbers = #tpu.dot_dimension_numbers<[1], [0], [0], [1], [0, 0, 1, 1], [], []>} : vector<2x64xf32>, vector<64x128xf32>, vector<2x128xf32> -> vector<2x128xf32>
      %c0_15 = arith.constant 0 : index
      %c0_16 = arith.constant 0 : index
      %16 = vector.load %arg4[%c0_15, %c0_16] : memref<1x128xf32, #tpu.memory_space<vmem>>, vector<1x128xf32>
      %17 = vector.broadcast %16 : vector<1x128xf32> to vector<2x128xf32>
      %18 = arith.addf %15, %17 : vector<2x128xf32>
      %c0_17 = arith.constant 0 : index
      %c0_18 = arith.constant 0 : index
      %19 = vector.load %arg5[%c0_17, %c0_18] : memref<128x512xf32, #tpu.memory_space<vmem>>, vector<128x512xf32>
      %cst_19 = arith.constant dense<0.000000e+00> : vector<2x512xf32>
      %20 = tpu.matmul %18, %19, %cst_19 {dimension_numbers = #tpu.dot_dimension_numbers<[1], [0], [0], [1], [0, 0, 1, 1], [], []>} : vector<2x128xf32>, vector<128x512xf32>, vector<2x512xf32> -> vector<2x512xf32>
      %c0_20 = arith.constant 0 : index
      %c0_21 = arith.constant 0 : index
      %21 = vector.load %arg6[%c0_20, %c0_21] : memref<1x512xf32, #tpu.memory_space<vmem>>, vector<1x512xf32>
      %22 = vector.broadcast %21 : vector<1x512xf32> to vector<2x512xf32>
      %23 = arith.addf %20, %22 : vector<2x512xf32>
      %cst_22 = arith.constant 0.000000e+00 : f32
      %24 = vector.broadcast %cst_22 : f32 to vector<2x512xf32>
      %25 = arith.maximumf %23, %24 : vector<2x512xf32>
      %c0_23 = arith.constant 0 : index
      %c0_24 = arith.constant 0 : index
      %26 = vector.load %arg7[%c0_23, %c0_24] : memref<512x128xf32, #tpu.memory_space<vmem>>, vector<512x128xf32>
      %cst_25 = arith.constant dense<0.000000e+00> : vector<2x128xf32>
      %27 = tpu.matmul %25, %26, %cst_25 {dimension_numbers = #tpu.dot_dimension_numbers<[1], [0], [0], [1], [0, 0, 1, 1], [], []>} : vector<2x512xf32>, vector<512x128xf32>, vector<2x128xf32> -> vector<2x128xf32>
      %c0_26 = arith.constant 0 : index
      %c0_27 = arith.constant 0 : index
      %28 = vector.load %arg8[%c0_26, %c0_27] : memref<1x128xf32, #tpu.memory_space<vmem>>, vector<1x128xf32>
      %29 = vector.broadcast %28 : vector<1x128xf32> to vector<2x128xf32>
      %30 = arith.addf %27, %29 : vector<2x128xf32>
      %c0_28 = arith.constant 0 : index
      %c0_29 = arith.constant 0 : index
      %31 = vector.load %arg9[%c0_28, %c0_29] : memref<2x128xf32, #tpu.memory_space<vmem>>, vector<2x128xf32>
      tpu.vector_store %arg9[%c0_28, %c0_29], %30 {strides = array<i32>} : memref<2x128xf32, #tpu.memory_space<vmem>>, vector<2x128xf32>,
    } else {
    }
    return
  }
  func.func @transform_0(%arg0: i32, %arg1: i32) -> (i32, i32, i32) {
    %c0_i32 = arith.constant 0 : i32
    %c0_i32_0 = arith.constant 0 : i32
    return %arg0, %arg1, %c0_i32 : i32, i32, i32
  }
  func.func @transform_1(%arg0: i32, %arg1: i32) -> (i32, i32) {
    %c0_i32 = arith.constant 0 : i32
    %c0_i32_0 = arith.constant 0 : i32
    %c0_i32_1 = arith.constant 0 : i32
    return %c0_i32, %c0_i32_0 : i32, i32
  }
  func.func @transform_2(%arg0: i32, %arg1: i32) -> (i32, i32) {
    %c0_i32 = arith.constant 0 : i32
    %c0_i32_0 = arith.constant 0 : i32
    %c0_i32_1 = arith.constant 0 : i32
    return %c0_i32, %c0_i32_0 : i32, i32
  }
  func.func @transform_3(%arg0: i32, %arg1: i32) -> (i32, i32) {
    %c0_i32 = arith.constant 0 : i32
    %c0_i32_0 = arith.constant 0 : i32
    %c0_i32_1 = arith.constant 0 : i32
    return %c0_i32, %c0_i32_0 : i32, i32
  }
  func.func @transform_4(%arg0: i32, %arg1: i32) -> (i32, i32) {
    %c0_i32 = arith.constant 0 : i32
    %c0_i32_0 = arith.constant 0 : i32
    %c0_i32_1 = arith.constant 0 : i32
    return %c0_i32, %c0_i32_0 : i32, i32
  }
  func.func @transform_5(%arg0: i32, %arg1: i32) -> (i32, i32) {
    %c0_i32 = arith.constant 0 : i32
    %c0_i32_0 = arith.constant 0 : i32
    %c0_i32_1 = arith.constant 0 : i32
    return %c0_i32, %c0_i32_0 : i32, i32
  }
  func.func @transform_6(%arg0: i32, %arg1: i32) -> (i32, i32) {
    %c0_i32 = arith.constant 0 : i32
    %c0_i32_0 = arith.constant 0 : i32
    %c0_i32_1 = arith.constant 0 : i32
    return %c0_i32, %c0_i32_0 : i32, i32
  }
  func.func @transform_7(%arg0: i32, %arg1: i32) -> (i32, i32) {
    %c0_i32 = arith.constant 0 : i32
    %c0_i32_0 = arith.constant 0 : i32
    return %arg0, %c0_i32 : i32, i32
  }
}

module attributes {stable_mosaic.version = 11 : i64} {
  func.func @audio_classifier_kernel(%arg0: i32, %arg1: i32, %arg2: memref<2x8x64xf32, #tpu.memory_space<vmem>>, %arg3: memref<64x128xf32, #tpu.memory_space<vmem>>, %arg4: memref<1x128xf32, #tpu.memory_space<vmem>>, %arg5: memref<128x512xf32, #tpu.memory_space<vmem>>, %arg6: memref<1x512xf32, #tpu.memory_space<vmem>>, %arg7: memref<512x128xf32, #tpu.memory_space<vmem>>, %arg8: memref<1x128xf32, #tpu.memory_space<vmem>>, %arg9: memref<2x128xf32, #tpu.memory_space<vmem>>, %arg10: memref<2x64xf32, #tpu.memory_space<vmem>>) attributes {dimension_semantics = [#tpu.dimension_semantics<parallel>, #tpu.dimension_semantics<arbitrary>], iteration_bounds = array<i64: 1, 1>, scalar_prefetch = 0 : i64, scratch_operands = 1 : i64, tpu.core_type = #tpu.core_type<tc>, window_params = [{transform_indices = @transform_0, window_bounds = array<i64: 2, 8, 64>}, {pipeline_mode = #tpu.pipeline_mode<synchronous>, transform_indices = @transform_1, window_bounds = array<i64: 64, 128>}, {pipeline_mode = #tpu.pipeline_mode<synchronous>, transform_indices = @transform_2, window_bounds = array<i64: 1, 128>}, {pipeline_mode = #tpu.pipeline_mode<synchronous>, transform_indices = @transform_3, window_bounds = array<i64: 128, 512>}, {pipeline_mode = #tpu.pipeline_mode<synchronous>, transform_indices = @transform_4, window_bounds = array<i64: 1, 512>}, {pipeline_mode = #tpu.pipeline_mode<synchronous>, transform_indices = @transform_5, window_bounds = array<i64: 512, 128>}, {pipeline_mode = #tpu.pipeline_mode<synchronous>, transform_indices = @transform_6, window_bounds = array<i64: 1, 128>}, {transform_indices = @transform_7, window_bounds = array<i64: 2, 128>}]} {
    %c0_i32 = arith.constant 0 : i32
    %0 = arith.cmpi eq, %arg1, %c0_i32 : i32
    %1 = arith.extui %0 : i1 to i32
    %c0_i32_0 = arith.constant 0 : i32
    %2 = arith.cmpi ne, %1, %c0_i32_0 : i32
    scf.if %2 {
      %cst_9 = arith.constant 0.000000e+00 : f32
      %11 = vector.broadcast %cst_9 : f32 to vector<2x64xf32>
      %c0_10 = arith.constant 0 : index
      %c0_11 = arith.constant 0 : index
      %12 = vector.load %arg10[%c0_10, %c0_11] : memref<2x64xf32, #tpu.memory_space<vmem>>, vector<2x64xf32>
      tpu.vector_store %arg10[%c0_10, %c0_11], %11 {strides = array<i32>} : memref<2x64xf32, #tpu.memory_space<vmem>>, vector<2x64xf32>,
    } else {
    }
    %c0 = arith.constant 0 : index
    %c0_1 = arith.constant 0 : index
    %c0_2 = arith.constant 0 : index
    %3 = vector.load %arg2[%c0, %c0_1, %c0_2] : memref<2x8x64xf32, #tpu.memory_space<vmem>>, vector<2x8x64xf32>
    %c0_3 = arith.constant 0 : index
    %c0_4 = arith.constant 0 : index
    %4 = vector.load %arg10[%c0_3, %c0_4] : memref<2x64xf32, #tpu.memory_space<vmem>>, vector<2x64xf32>
    %cst = arith.constant dense<0.000000e+00> : vector<2x64xf32>
    %5 = vector.multi_reduction <add>, %3, %cst [1] : vector<2x8x64xf32> to vector<2x64xf32>
    %6 = arith.addf %4, %5 : vector<2x64xf32>
    %c0_5 = arith.constant 0 : index
    %c0_6 = arith.constant 0 : index
    %7 = vector.load %arg10[%c0_5, %c0_6] : memref<2x64xf32, #tpu.memory_space<vmem>>, vector<2x64xf32>
    tpu.vector_store %arg10[%c0_5, %c0_6], %6 {strides = array<i32>} : memref<2x64xf32, #tpu.memory_space<vmem>>, vector<2x64xf32>,
    %c0_i32_7 = arith.constant 0 : i32
    %8 = arith.cmpi eq, %arg1, %c0_i32_7 : i32
    %9 = arith.extui %8 : i1 to i32
    %c0_i32_8 = arith.constant 0 : i32
    %10 = arith.cmpi ne, %9, %c0_i32_8 : i32
    scf.if %10 {
      %c0_9 = arith.constant 0 : index
      %c0_10 = arith.constant 0 : index
      %11 = vector.load %arg10[%c0_9, %c0_10] : memref<2x64xf32, #tpu.memory_space<vmem>>, vector<2x64xf32>
      %cst_11 = arith.constant 1.250000e-01 : f32
      %12 = vector.broadcast %cst_11 : f32 to vector<2x64xf32>
      %13 = arith.mulf %11, %12 : vector<2x64xf32>
      %c0_12 = arith.constant 0 : index
      %c0_13 = arith.constant 0 : index
      %14 = vector.load %arg3[%c0_12, %c0_13] : memref<64x128xf32, #tpu.memory_space<vmem>>, vector<64x128xf32>
      %cst_14 = arith.constant dense<0.000000e+00> : vector<2x128xf32>
      %15 = tpu.matmul %13, %14, %cst_14 {dimension_numbers = #tpu.dot_dimension_numbers<[1], [0], [0], [1], [0, 0, 1, 1], [], []>} : vector<2x64xf32>, vector<64x128xf32>, vector<2x128xf32> -> vector<2x128xf32>
      %c0_15 = arith.constant 0 : index
      %c0_16 = arith.constant 0 : index
      %16 = vector.load %arg4[%c0_15, %c0_16] : memref<1x128xf32, #tpu.memory_space<vmem>>, vector<1x128xf32>
      %17 = vector.broadcast %16 : vector<1x128xf32> to vector<2x128xf32>
      %18 = arith.addf %15, %17 : vector<2x128xf32>
      %c0_17 = arith.constant 0 : index
      %c0_18 = arith.constant 0 : index
      %19 = vector.load %arg5[%c0_17, %c0_18] : memref<128x512xf32, #tpu.memory_space<vmem>>, vector<128x512xf32>
      %cst_19 = arith.constant dense<0.000000e+00> : vector<2x512xf32>
      %20 = tpu.matmul %18, %19, %cst_19 {dimension_numbers = #tpu.dot_dimension_numbers<[1], [0], [0], [1], [0, 0, 1, 1], [], []>} : vector<2x128xf32>, vector<128x512xf32>, vector<2x512xf32> -> vector<2x512xf32>
      %c0_20 = arith.constant 0 : index
      %c0_21 = arith.constant 0 : index
      %21 = vector.load %arg6[%c0_20, %c0_21] : memref<1x512xf32, #tpu.memory_space<vmem>>, vector<1x512xf32>
      %22 = vector.broadcast %21 : vector<1x512xf32> to vector<2x512xf32>
      %23 = arith.addf %20, %22 : vector<2x512xf32>
      %cst_22 = arith.constant 0.000000e+00 : f32
      %24 = vector.broadcast %cst_22 : f32 to vector<2x512xf32>
      %25 = arith.maximumf %23, %24 : vector<2x512xf32>
      %c0_23 = arith.constant 0 : index
      %c0_24 = arith.constant 0 : index
      %26 = vector.load %arg7[%c0_23, %c0_24] : memref<512x128xf32, #tpu.memory_space<vmem>>, vector<512x128xf32>
      %cst_25 = arith.constant dense<0.000000e+00> : vector<2x128xf32>
      %27 = tpu.matmul %25, %26, %cst_25 {dimension_numbers = #tpu.dot_dimension_numbers<[1], [0], [0], [1], [0, 0, 1, 1], [], []>} : vector<2x512xf32>, vector<512x128xf32>, vector<2x128xf32> -> vector<2x128xf32>
      %c0_26 = arith.constant 0 : index
      %c0_27 = arith.constant 0 : index
      %28 = vector.load %arg8[%c0_26, %c0_27] : memref<1x128xf32, #tpu.memory_space<vmem>>, vector<1x128xf32>
      %29 = vector.broadcast %28 : vector<1x128xf32> to vector<2x128xf32>
      %30 = arith.addf %27, %29 : vector<2x128xf32>
      %c0_28 = arith.constant 0 : index
      %c0_29 = arith.constant 0 : index
      %31 = vector.load %arg9[%c0_28, %c0_29] : memref<2x128xf32, #tpu.memory_space<vmem>>, vector<2x128xf32>
      tpu.vector_store %arg9[%c0_28, %c0_29], %30 {strides = array<i32>} : memref<2x128xf32, #tpu.memory_space<vmem>>, vector<2x128xf32>,
    } else {
    }
    return
  }
  func.func @transform_0(%arg0: i32, %arg1: i32) -> (i32, i32, i32) {
    %c0_i32 = arith.constant 0 : i32
    %c0_i32_0 = arith.constant 0 : i32
    return %arg0, %arg1, %c0_i32 : i32, i32, i32
  }
  func.func @transform_1(%arg0: i32, %arg1: i32) -> (i32, i32) {
    %c0_i32 = arith.constant 0 : i32
    %c0_i32_0 = arith.constant 0 : i32
    %c0_i32_1 = arith.constant 0 : i32
    return %c0_i32, %c0_i32_0 : i32, i32
  }
  func.func @transform_2(%arg0: i32, %arg1: i32) -> (i32, i32) {
    %c0_i32 = arith.constant 0 : i32
    %c0_i32_0 = arith.constant 0 : i32
    %c0_i32_1 = arith.constant 0 : i32
    return %c0_i32, %c0_i32_0 : i32, i32
  }
  func.func @transform_3(%arg0: i32, %arg1: i32) -> (i32, i32) {
    %c0_i32 = arith.constant 0 : i32
    %c0_i32_0 = arith.constant 0 : i32
    %c0_i32_1 = arith.constant 0 : i32
    return %c0_i32, %c0_i32_0 : i32, i32
  }
  func.func @transform_4(%arg0: i32, %arg1: i32) -> (i32, i32) {
    %c0_i32 = arith.constant 0 : i32
    %c0_i32_0 = arith.constant 0 : i32
    %c0_i32_1 = arith.constant 0 : i32
    return %c0_i32, %c0_i32_0 : i32, i32
  }
  func.func @transform_5(%arg0: i32, %arg1: i32) -> (i32, i32) {
    %c0_i32 = arith.constant 0 : i32
    %c0_i32_0 = arith.constant 0 : i32
    %c0_i32_1 = arith.constant 0 : i32
    return %c0_i32, %c0_i32_0 : i32, i32
  }
  func.func @transform_6(%arg0: i32, %arg1: i32) -> (i32, i32) {
    %c0_i32 = arith.constant 0 : i32
    %c0_i32_0 = arith.constant 0 : i32
    %c0_i32_1 = arith.constant 0 : i32
    return %c0_i32, %c0_i32_0 : i32, i32
  }
  func.func @transform_7(%arg0: i32, %arg1: i32) -> (i32, i32) {
    %c0_i32 = arith.constant 0 : i32
    %c0_i32_0 = arith.constant 0 : i32
    return %arg0, %c0_i32 : i32, i32
  }
}

</mosaic_0001>

<bundles_post_ra>
// kernel: tpu_custom_call.1
= control target key start
LH: loop header
LB: loop body
LE: loop exit
PB: predicated region body
PF: predicated region fallthrough
CT: control target
= control target key end

     0   :  { %12 = vsyncpa [#allocation4], 0  ;;  %s989_s0 = inlined_call_operand.hbm [shape: f32[2,8,64], index: 0, kind: input, shape index: {}]   ;;  %s990_s1 = inlined_call_operand.hbm [shape: f32[64,128], index: 1, kind: input, shape index: {}]   ;;  %s991_s2 = inlined_call_operand.vmem [shape: f32[1,128], index: 2, kind: input, shape index: {}]   ;;  %s992_s3 = inlined_call_operand.hbm [shape: f32[128,512], index: 3, kind: input, shape index: {}]   ;;  %s993_s4 = inlined_call_operand.vmem [shape: f32[1,512], index: 4, kind: input, shape index: {}]   ;;  %s994_s5 = inlined_call_operand.hbm [shape: f32[512,128], index: 5, kind: input, shape index: {}]   ;;  %s995_s6 = inlined_call_operand.vmem [shape: f32[1,128], index: 6, kind: input, shape index: {}]   ;;  %s996_s7 = inlined_call_operand.hbm [shape: f32[2,128], index: 7, kind: output, shape index: {}]  }
   0x1   :  { %13 = vsyncpa [#allocation7], 0 }
   0x2   :  { %14 = vsyncpa [#allocation10], 0 }
   0x3   :  { %15 = vsyncpa [#allocation5], 0  ;;  %s888_s24 = smov [#allocation6]   ;;  %s889_s26 = smov [#allocation3]  }
   0x4   :  { %s33_s25 = sshll.u32 %s888_s24, 4  ;;  %s21_s27 = sshll.u32 %s889_s26, 4  ;;  %s34_s25 = int_to_ptr.vmem [resolvable:$true] %s33_s25  ;;  %s22_s27 = int_to_ptr.vmem [resolvable:$true] %s21_s27 }
   0x5   :  { %s788_s28 = scalar_lea.vmem %s34_s25, 1024  ;;  %p793_p1 = scmp.lt.s32.totalorder %s34_s25, %s34_s25 }
   0x6   :  { %p789_p0 = scmp.ne.s32.totalorder %s34_s25, %s788_s28  ;;  %p794_p2 = scmp.lt.s32.totalorder %s788_s28, %s788_s28 }
   0x8   :  { %p795_p3 = por %p794_p2, %p793_p1 }
   0xa   :  { %p796_p4 = pnand %p795_p3, %p789_p0 }
   0xc   :  { %799 = shalt.err (!%p796_p4)
}
   0xd   :  { %s890_s29 = smov 128   ;;  %s891_s30 = smov 8  }
   0xe   :  { %39 = dma.hbm_to_vmem [thread:$0]  %s990_s1, 1024, %s34_s25, [#allocation7], %s890_s29, %s890_s29, %s891_s30  }
   0xf   :  { %s808_s10 = scalar_lea.vmem %s22_s27, 256  ;;  %p813_p6 = scmp.lt.s32.totalorder %s22_s27, %s22_s27 }
  0x10   :  { %p809_p5 = scmp.ne.s32.totalorder %s22_s27, %s808_s10  ;;  %p814_p7 = scmp.lt.s32.totalorder %s808_s10, %s808_s10 }
  0x12   :  { %p815_p8 = por %p814_p7, %p813_p6 }
  0x14   :  { %p816_p9 = pnand %p815_p8, %p809_p5 }
  0x16   :  { %819 = shalt.err (!%p816_p9)
}
  0x17   :  { %27 = dma.hbm_to_vmem [thread:$0]  %s989_s0, 256, %s22_s27, [#allocation4], %s890_s29, %s890_s29, %s891_s30  }
  0x18   :  { %s892_s13 = smov [#allocation8]  }
  0x19   :  { %s47_s14 = sshll.u32 %s892_s13, 4  ;;  %s48_s14 = int_to_ptr.vmem [resolvable:$true] %s47_s14 }
  0x1a   :  { %s828_s15 = scalar_lea.vmem %s48_s14, 8192  ;;  %p833_p11 = scmp.lt.s32.totalorder %s48_s14, %s48_s14 }
  0x1b   :  { %p829_p10 = scmp.ne.s32.totalorder %s48_s14, %s828_s15  ;;  %p834_p12 = scmp.lt.s32.totalorder %s828_s15, %s828_s15 }
  0x1d   :  { %p835_p13 = por %p834_p12, %p833_p11 }
  0x1f   :  { %p836_p0 = pnand %p835_p13, %p829_p10 }
  0x21   :  { %839 = shalt.err (!%p836_p0)
}
  0x22   :  { %s893_s1 = smov 512   ;;  %s894_s16 = smov 32  }
  0x23   :  { %53 = dma.hbm_to_vmem [thread:$0]  %s992_s3, 8192, %s48_s14, [#allocation7], %s893_s1, %s893_s1, %s894_s16  }
  0x24   :  { %s895_s19 = smov [#allocation9]  }
  0x25   :  { %s61_s20 = sshll.u32 %s895_s19, 4  ;;  %s62_s20 = int_to_ptr.vmem [resolvable:$true] %s61_s20 }
  0x26   :  { %s848_s0 = scalar_lea.vmem %s62_s20, 8192  ;;  %p853_p2 = scmp.lt.s32.totalorder %s62_s20, %s62_s20 }
  0x27   :  { %p849_p1 = scmp.ne.s32.totalorder %s62_s20, %s848_s0  ;;  %p854_p3 = scmp.lt.s32.totalorder %s848_s0, %s848_s0 }
  0x29   :  { %p855_p4 = por %p854_p3, %p853_p2 }
  0x2b   :  { %p856_p5 = pnand %p855_p4, %p849_p1 }
  0x2d   :  { %859 = shalt.err (!%p856_p5)
}
  0x2e   :  { %67 = dma.hbm_to_vmem [thread:$0]  %s994_s5, 8192, %s62_s20, [#allocation10], %s890_s29, %s890_s29, %s891_s30  }
  0x2f   :  { %880 = dma.done.wait [#allocation4], 256  }
  0x30   :  { %881 = vsyncadd [#allocation4], 4294967040 }
  0x31   :  { %882 = dma.done.wait [#allocation7], 9216  }
  0x32   :  { %883 = vsyncadd [#allocation7], 4294958080 }
  0x33   :  { %884 = dma.done.wait [#allocation10], 8192  }
  0x34   :  { %885 = vsyncadd [#allocation10], 4294959104  ;;  %vm86_vm0 = vcmask 517120   ;;  %v896_v0 = vmov 0.0   ;;  %vm897_vm1 = vmmov 0   ;;  %v126_v1 = vld [vmem:[#allocation6 + $0x38] sm:$0xff] }
  0x35   :  { %750 = vmatprep.subr.mxu0 %v896_v0  ;;  %766 = vmatprep.mubr.msk.f32.mxu0 %vm897_vm1, %v896_v0  ;;  %87 = vst.msk [vmem:[#allocation2] sm:$0x3] %vm86_vm0, %v896_v0  ;;  %v125_v2 = vld [vmem:[#allocation6 + $0x30] sm:$0xff]  ;;  %vm91_vm2 = vcmask 523264   ;;  %v124_v3 = vld [vmem:[#allocation6 + $0x28] sm:$0xff]  ;;  %v89_v5 = vld [vmem:[#allocation3 + $0x8] sm:$0xff] }
  0x36   :  { %357 = vmatprep.mubr.f32.mxu1 %v896_v0  ;;  %751 = vmatpush3.msra.mxu0 %v126_v1  ;;  %v88_v4 = vld [vmem:[#allocation3] sm:$0xff]  ;;  %v268_v7 = vld [vmem:[#allocation8 + $0x1e8] sm:$0xff]  ;;  %v123_v8 = vld [vmem:[#allocation6 + $0x20] sm:$0xff]  ;;  %v99_v10 = vsel %vm91_vm2, %v89_v5, 0.0  ;;  %vm108_vm3 = vcmask 1041409   ;;  %s898_s25 = smov [#allocation11]  }
  0x37   :  { %752 = vmatprep.subr.mxu0 %v896_v0  ;;  %v92_v6 = vsel %vm91_vm2, %v88_v4, 0.0  ;;  %293 = vmatprep.subr.mxu1 %v268_v7  ;;  %v267_v11 = vld [vmem:[#allocation8 + $0x1e0] sm:$0xff]  ;;  %v100_v12 = vrot.slane %v99_v10, 4  ;;  %v264_v13 = vld [vmem:[#allocation8 + $0x1c8] sm:$0xff]  ;;  %v122_v15 = vld [vmem:[#allocation6 + $0x18] sm:$0xff]  ;;  %s657_s26 = sshll.u32 %s898_s25, 4  ;;  %s658_s26 = int_to_ptr.vmem [resolvable:$true] %s657_s26 }
  0x38   :  { %753 = vmatpush3.msra.mxu0 %v125_v2  ;;  %v93_v9 = vrot.slane %v92_v6, 4  ;;  %294 = vmatpush1.msra.mxu1 %v267_v11  ;;  %v263_v14 = vld [vmem:[#allocation8 + $0x1c0] sm:$0xff]  ;;  %v260_v17 = vld [vmem:[#allocation8 + $0x1a8] sm:$0xff]  ;;  %v121_v21 = vld [vmem:[#allocation6 + $0x10] sm:$0xff]  ;;  %s860_s27 = scalar_lea.vmem %s658_s26, 32  ;;  %p865_p7 = scmp.lt.s32.totalorder %s658_s26, %s658_s26 }
  0x39   :  { %754 = vmatprep.subr.mxu0 %v896_v0  ;;  %295 = vmatprep.subr.mxu1 %v264_v13  ;;  %v101_v18 = vadd.f32 %v100_v12, %v99_v10  ;;  %v259_v19 = vld [vmem:[#allocation8 + $0x1a0] sm:$0xff]  ;;  %v256_v20 = vld [vmem:[#allocation8 + $0x188] sm:$0xff]  ;;  %v270_v35 = vld [vmem:[#allocation8 + $0x1f8] sm:$0xff]  ;;  %p861_p6 = scmp.ne.s32.totalorder %s658_s26, %s860_s27  ;;  %p866_p8 = scmp.lt.s32.totalorder %s860_s27, %s860_s27 }
  0x3a   :  { %755 = vmatpush3.msra.mxu0 %v124_v3  ;;  %v94_v16 = vadd.f32 %v93_v9, %v92_v6  ;;  %296 = vmatpush1.msra.mxu1 %v263_v14  ;;  %v255_v23 = vld [vmem:[#allocation8 + $0x180] sm:$0xff]  ;;  %v252_v25 = vld [vmem:[#allocation8 + $0x168] sm:$0xff]  ;;  %v269_v58 = vld [vmem:[#allocation8 + $0x1f0] sm:$0xff] }
  0x3b   :  { %756 = vmatprep.subr.mxu0 %v896_v0  ;;  %297 = vmatprep.subr.mxu1 %v260_v17  ;;  %v102_v24 = vrot.slane %v101_v18, 2  ;;  %v120_v26 = vld [vmem:[#allocation6 + $0x8] sm:$0xff]  ;;  %v251_v28 = vld [vmem:[#allocation8 + $0x160] sm:$0xff]  ;;  %v266_v60 = vld [vmem:[#allocation8 + $0x1d8] sm:$0xff]  ;;  %p867_p9 = por %p866_p8, %p865_p7 }
  0x3c   :  { %757 = vmatpush3.msra.mxu0 %v123_v8  ;;  %v95_v22 = vrot.slane %v94_v16, 2  ;;  %298 = vmatpush1.msra.mxu1 %v259_v19  ;;  %v248_v30 = vld [vmem:[#allocation8 + $0x148] sm:$0xff]  ;;  %v119_v31 = vld [vmem:[#allocation6] sm:$0xff]  ;;  %v265_v62 = vld [vmem:[#allocation8 + $0x1d0] sm:$0xff] }
  0x3d   :  { %758 = vmatprep.subr.mxu0 %v896_v0  ;;  %299 = vmatprep.subr.mxu1 %v256_v20  ;;  %v103_v29 = vadd.f32 %v102_v24, %v101_v18  ;;  %v247_v33 = vld [vmem:[#allocation8 + $0x140] sm:$0xff]  ;;  %v244_v36 = vld [vmem:[#allocation8 + $0x128] sm:$0xff]  ;;  %v262_v63 = vld [vmem:[#allocation8 + $0x1b8] sm:$0xff]  ;;  %p868_p10 = pnand %p867_p9, %p861_p6 }
  0x3e   :  { %759 = vmatpush3.msra.mxu0 %v122_v15  ;;  %v96_v27 = vadd.f32 %v95_v22, %v94_v16  ;;  %300 = vmatpush1.msra.mxu1 %v255_v23  ;;  %v243_v38 = vld [vmem:[#allocation8 + $0x120] sm:$0xff]  ;;  %v90_v39 = vld [vmem:[#allocation2] sm:$0x3]  ;;  %v261_v1 = vld [vmem:[#allocation8 + $0x1b0] sm:$0xff] }
  0x3f   :  { %760 = vmatprep.subr.mxu0 %v896_v0  ;;  %301 = vmatprep.subr.mxu1 %v252_v25  ;;  %v104_v34 = vrot.slane %v103_v29, 1  ;;  %v240_v41 = vld [vmem:[#allocation8 + $0x108] sm:$0xff]  ;;  %v239_v42 = vld [vmem:[#allocation8 + $0x100] sm:$0xff]  ;;  %v258_v2 = vld [vmem:[#allocation8 + $0x198] sm:$0xff] }
  0x40   :  { %761 = vmatpush3.msra.mxu0 %v121_v21  ;;  %v97_v32 = vrot.slane %v96_v27, 1  ;;  %302 = vmatpush1.msra.mxu1 %v251_v28  ;;  %v236_v44 = vld [vmem:[#allocation8 + $0xe8] sm:$0xff]  ;;  %v235_v46 = vld [vmem:[#allocation8 + $0xe0] sm:$0xff]  ;;  %v257_v3 = vld [vmem:[#allocation8 + $0x190] sm:$0xff] }
  0x41   :  { %762 = vmatprep.subr.mxu0 %v896_v0  ;;  %303 = vmatprep.subr.mxu1 %v248_v30  ;;  %v105_v40 = vadd.f32 %v104_v34, %v103_v29  ;;  %v232_v47 = vld [vmem:[#allocation8 + $0xc8] sm:$0xff]  ;;  %v231_v48 = vld [vmem:[#allocation8 + $0xc0] sm:$0xff]  ;;  %v254_v4 = vld [vmem:[#allocation8 + $0x178] sm:$0xff] }
  0x42   :  { %763 = vmatpush3.msra.mxu0 %v120_v26  ;;  %v98_v37 = vadd.f32 %v97_v32, %v96_v27  ;;  %304 = vmatpush1.msra.mxu1 %v247_v33  ;;  %v228_v49 = vld [vmem:[#allocation8 + $0xa8] sm:$0xff]  ;;  %v227_v50 = vld [vmem:[#allocation8 + $0xa0] sm:$0xff]  ;;  %v253_v5 = vld [vmem:[#allocation8 + $0x170] sm:$0xff] }
  0x43   :  { %764 = vmatprep.subr.mxu0 %v896_v0  ;;  %305 = vmatprep.subr.mxu1 %v244_v36  ;;  %v224_v51 = vld [vmem:[#allocation8 + $0x88] sm:$0xff]  ;;  %v223_v52 = vld [vmem:[#allocation8 + $0x80] sm:$0xff]  ;;  %v250_v6 = vld [vmem:[#allocation8 + $0x158] sm:$0xff] }
  0x44   :  { %765 = vmatpush3.msra.mxu0 %v119_v31  ;;  %v109_v43 = vsel %vm108_vm3, %v105_v40, %v98_v37  ;;  %306 = vmatpush1.msra.mxu1 %v243_v38  ;;  %v220_v53 = vld [vmem:[#allocation8 + $0x68] sm:$0xff]  ;;  %v219_v54 = vld [vmem:[#allocation8 + $0x60] sm:$0xff]  ;;  %v249_v7 = vld [vmem:[#allocation8 + $0x150] sm:$0xff] }
  0x45   :  { %364 = vmatprep.subr.mxu0 %v270_v35  ;;  %v111_v45 = vadd.f32 %v109_v43, %v90_v39  ;;  %307 = vmatprep.subr.mxu1 %v240_v41  ;;  %v216_v56 = vld [vmem:[#allocation8 + $0x48] sm:$0xff]  ;;  %v215_v59 = vld [vmem:[#allocation8 + $0x40] sm:$0xff]  ;;  %v246_v8 = vld [vmem:[#allocation8 + $0x138] sm:$0xff] }
  0x46   :  { %308 = vmatpush1.msra.mxu1 %v239_v42  ;;  %v212_v61 = vld [vmem:[#allocation8 + $0x28] sm:$0xff]  ;;  %v245_v9 = vld [vmem:[#allocation8 + $0x130] sm:$0xff]  ;;  %v242_v10 = vld [vmem:[#allocation8 + $0x118] sm:$0xff] }
  0x47   :  { %113 = vst.msk [vmem:[#allocation2] sm:$0x3] %vm86_vm0, %v111_v45  ;;  %309 = vmatprep.subr.mxu1 %v236_v44  ;;  %v241_v11 = vld [vmem:[#allocation8 + $0x110] sm:$0xff]  ;;  %v234_v13 = vld [vmem:[#allocation8 + $0xd8] sm:$0xff]  ;;  %v211_v24 = vld [vmem:[#allocation8 + $0x20] sm:$0xff] }
  0x48   :  { %310 = vmatpush1.msra.mxu1 %v235_v46  ;;  %v237_v12 = vld [vmem:[#allocation8 + $0xf0] sm:$0xff]  ;;  %v230_v15 = vld [vmem:[#allocation8 + $0xb8] sm:$0xff]  ;;  %v208_v26 = vld [vmem:[#allocation8 + $0x8] sm:$0xff] }
  0x49   :  { %311 = vmatprep.subr.mxu1 %v232_v47  ;;  %v233_v14 = vld [vmem:[#allocation8 + $0xd0] sm:$0xff]  ;;  %v226_v17 = vld [vmem:[#allocation8 + $0x98] sm:$0xff]  ;;  %v207_v28 = vld [vmem:[#allocation8] sm:$0xff] }
  0x4a   :  { %312 = vmatpush1.msra.mxu1 %v231_v48  ;;  %v229_v16 = vld [vmem:[#allocation8 + $0xb0] sm:$0xff]  ;;  %v222_v19 = vld [vmem:[#allocation8 + $0x78] sm:$0xff]  ;;  %v668_v32 = vld [vmem:[%s991_s2] ss:$0 sm:$0xff] }
  0x4b   :  { %313 = vmatprep.subr.mxu1 %v228_v49  ;;  %v225_v18 = vld [vmem:[#allocation8 + $0x90] sm:$0xff]  ;;  %v218_v21 = vld [vmem:[#allocation8 + $0x58] sm:$0xff]  ;;  %v468_v42 = vld [vmem:[#allocation9 + $0xe8] sm:$0xff] }
  0x4c   :  { %314 = vmatpush1.msra.mxu1 %v227_v50  ;;  %v221_v20 = vld [vmem:[#allocation8 + $0x70] sm:$0xff]  ;;  %v214_v23 = vld [vmem:[#allocation8 + $0x38] sm:$0xff]  ;;  %v500_v43 = vld [vmem:[#allocation9 + $0x1e8] sm:$0xff] }
  0x4d   :  { %315 = vmatprep.subr.mxu1 %v224_v51  ;;  %v217_v22 = vld [vmem:[#allocation8 + $0x50] sm:$0xff]  ;;  %v210_v27 = vld [vmem:[#allocation8 + $0x18] sm:$0xff]  ;;  %v452_v44 = vld [vmem:[#allocation9 + $0x68] sm:$0xff] }
  0x4e   :  { %v117_v55 = vld [vmem:[#allocation2] sm:$0x3]  ;;  %316 = vmatpush1.msra.mxu1 %v223_v52  ;;  %v213_v25 = vld [vmem:[#allocation8 + $0x30] sm:$0xff]  ;;  %v470_v30 = vld [vmem:[#allocation9 + $0xf8] sm:$0xff] }
  0x4f   :  { %v118_v57 = vmul.f32 0.125, %v117_v55  ;;  %317 = vmatprep.subr.mxu1 %v220_v53  ;;  %v209_v29 = vld [vmem:[#allocation8 + $0x10] sm:$0xff]  ;;  %v502_v31 = vld [vmem:[#allocation9 + $0x1f8] sm:$0xff]  ;;  %v484_v45 = vld [vmem:[#allocation9 + $0x168] sm:$0xff] }
  0x50   :  { %318 = vmatpush1.msra.mxu1 %v219_v54  ;;  %v454_v35 = vld [vmem:[#allocation9 + $0x78] sm:$0xff]  ;;  %v469_v38 = vld [vmem:[#allocation9 + $0xf0] sm:$0xff]  ;;  %v467_v46 = vld [vmem:[#allocation9 + $0xe0] sm:$0xff] }
  0x51   :  { %767 = vmatmul.mubr.msk.f32.vlgmr.msra.gmra.mxu0 %vm91_vm2, %v118_v57  ;;  %319 = vmatprep.subr.mxu1 %v216_v56  ;;  %v486_v36 = vld [vmem:[#allocation9 + $0x178] sm:$0xff]  ;;  %v501_v39 = vld [vmem:[#allocation9 + $0x1f0] sm:$0xff]  ;;  %v499_v47 = vld [vmem:[#allocation9 + $0x1e0] sm:$0xff] }
  0x52   :  { %365 = vmatpush1.msra.mxu0 %v269_v58  ;;  %320 = vmatpush1.msra.mxu1 %v215_v59  ;;  %v453_v40 = vld [vmem:[#allocation9 + $0x70] sm:$0xff]  ;;  %v451_v48 = vld [vmem:[#allocation9 + $0x60] sm:$0xff]  ;;  %v466_v50 = vld [vmem:[#allocation9 + $0xd8] sm:$0xff] }
  0x53   :  { %366 = vmatprep.subr.mxu0 %v266_v60  ;;  %321 = vmatprep.subr.mxu1 %v212_v61  ;;  %v485_v41 = vld [vmem:[#allocation9 + $0x170] sm:$0xff]  ;;  %v483_v49 = vld [vmem:[#allocation9 + $0x160] sm:$0xff]  ;;  %v498_v51 = vld [vmem:[#allocation9 + $0x1d8] sm:$0xff] }
  0x54   :  { %367 = vmatpush1.msra.mxu0 %v265_v62  ;;  %428 = vmatprep.mubr.f32.mxu0 %v896_v0  ;;  %v238_v0 = vld [vmem:[#allocation8 + $0xf8] sm:$0xff]  ;;  %v465_v54 = vld [vmem:[#allocation9 + $0xd0] sm:$0xff]  ;;  %v464_v58 = vld [vmem:[#allocation9 + $0xc8] sm:$0xff] }
  0x55   :  { %368 = vmatprep.subr.mxu0 %v262_v63  ;;  %322 = vmatpush1.msra.mxu1 %v211_v24  ;;  %v450_v52 = vld [vmem:[#allocation9 + $0x58] sm:$0xff]  ;;  %v497_v55 = vld [vmem:[#allocation9 + $0x1d0] sm:$0xff]  ;;  %v496_v59 = vld [vmem:[#allocation9 + $0x1c8] sm:$0xff] }
  0x56   :  { %369 = vmatpush1.msra.mxu0 %v261_v1  ;;  %323 = vmatprep.subr.mxu1 %v208_v26  ;;  %v482_v53 = vld [vmem:[#allocation9 + $0x158] sm:$0xff]  ;;  %v449_v56 = vld [vmem:[#allocation9 + $0x50] sm:$0xff]  ;;  %v448_v60 = vld [vmem:[#allocation9 + $0x48] sm:$0xff] }
  0x57   :  { %370 = vmatprep.subr.mxu0 %v258_v2  ;;  %324 = vmatpush1.msra.mxu1 %v207_v28  ;;  %v481_v57 = vld [vmem:[#allocation9 + $0x150] sm:$0xff]  ;;  %v480_v61 = vld [vmem:[#allocation9 + $0x148] sm:$0xff]  ;;  %v463_v62 = vld [vmem:[#allocation9 + $0xc0] sm:$0xff] }
  0x58   :  { %371 = vmatpush1.msra.mxu0 %v257_v3  ;;  %680 = vmatprep.subr.mxu1 %v470_v30  ;;  %v495_v63 = vld [vmem:[#allocation9 + $0x1c0] sm:$0xff]  ;;  %v462_v3 = vld [vmem:[#allocation9 + $0xb8] sm:$0xff]  ;;  %v441_v24 = vld [vmem:[#allocation9 + $0x10] sm:$0xff] }
  0x59   :  { %372 = vmatprep.subr.mxu0 %v254_v4  ;;  %v447_v1 = vld [vmem:[#allocation9 + $0x40] sm:$0xff]  ;;  %v494_v4 = vld [vmem:[#allocation9 + $0x1b8] sm:$0xff]  ;;  %v456_v26 = vld [vmem:[#allocation9 + $0x88] sm:$0xff] }
  0x5a   :  { %373 = vmatpush1.msra.mxu0 %v253_v5  ;;  %v479_v2 = vld [vmem:[#allocation9 + $0x140] sm:$0xff]  ;;  %v446_v5 = vld [vmem:[#allocation9 + $0x38] sm:$0xff]  ;;  %v440_v28 = vld [vmem:[#allocation9 + $0x8] sm:$0xff] }
  0x5b   :  { %374 = vmatprep.subr.mxu0 %v250_v6  ;;  %v478_v6 = vld [vmem:[#allocation9 + $0x138] sm:$0xff]  ;;  %v455_v30 = vld [vmem:[#allocation9 + $0x80] sm:$0xff] }
  0x5c   :  { %375 = vmatpush1.msra.mxu0 %v249_v7  ;;  %v461_v7 = vld [vmem:[#allocation9 + $0xb0] sm:$0xff] }
  0x5d   :  { %376 = vmatprep.subr.mxu0 %v246_v8  ;;  %v493_v8 = vld [vmem:[#allocation9 + $0x1b0] sm:$0xff] }
  0x5e   :  { %377 = vmatpush1.msra.mxu0 %v245_v9  ;;  %v445_v9 = vld [vmem:[#allocation9 + $0x30] sm:$0xff] }
  0x5f   :  { %378 = vmatprep.subr.mxu0 %v242_v10  ;;  %v477_v10 = vld [vmem:[#allocation9 + $0x130] sm:$0xff] }
  0x60   :  { %379 = vmatpush1.msra.mxu0 %v241_v11  ;;  %v460_v11 = vld [vmem:[#allocation9 + $0xa8] sm:$0xff] }
  0x61   :  { %380 = vmatprep.subr.mxu0 %v238_v0  ;;  %v492_v0 = vld [vmem:[#allocation9 + $0x1a8] sm:$0xff] }
  0x62   :  { %381 = vmatpush1.msra.mxu0 %v237_v12  ;;  %v444_v12 = vld [vmem:[#allocation9 + $0x28] sm:$0xff] }
  0x63   :  { %382 = vmatprep.subr.mxu0 %v234_v13  ;;  %v476_v13 = vld [vmem:[#allocation9 + $0x128] sm:$0xff] }
  0x64   :  { %383 = vmatpush1.msra.mxu0 %v233_v14  ;;  %v459_v14 = vld [vmem:[#allocation9 + $0xa0] sm:$0xff] }
  0x65   :  { %384 = vmatprep.subr.mxu0 %v230_v15  ;;  %v491_v15 = vld [vmem:[#allocation9 + $0x1a0] sm:$0xff] }
  0x66   :  { %385 = vmatpush1.msra.mxu0 %v229_v16  ;;  %v443_v16 = vld [vmem:[#allocation9 + $0x20] sm:$0xff] }
  0x67   :  { %386 = vmatprep.subr.mxu0 %v226_v17  ;;  %v475_v17 = vld [vmem:[#allocation9 + $0x120] sm:$0xff] }
  0x68   :  { %387 = vmatpush1.msra.mxu0 %v225_v18  ;;  %v458_v18 = vld [vmem:[#allocation9 + $0x98] sm:$0xff] }
  0x69   :  { %388 = vmatprep.subr.mxu0 %v222_v19  ;;  %v490_v19 = vld [vmem:[#allocation9 + $0x198] sm:$0xff] }
  0x6a   :  { %389 = vmatpush1.msra.mxu0 %v221_v20  ;;  %v442_v20 = vld [vmem:[#allocation9 + $0x18] sm:$0xff] }
  0x6b   :  { %390 = vmatprep.subr.mxu0 %v218_v21  ;;  %v474_v21 = vld [vmem:[#allocation9 + $0x118] sm:$0xff] }
  0x6c   :  { %391 = vmatpush1.msra.mxu0 %v217_v22  ;;  %v457_v22 = vld [vmem:[#allocation9 + $0x90] sm:$0xff] }
  0x6d   :  { %392 = vmatprep.subr.mxu0 %v214_v23  ;;  %v489_v23 = vld [vmem:[#allocation9 + $0x190] sm:$0xff] }
  0x6e   :  { %393 = vmatpush1.msra.mxu0 %v213_v25  ;;  %v473_v25 = vld [vmem:[#allocation9 + $0x110] sm:$0xff] }
  0x6f   :  { %394 = vmatprep.subr.mxu0 %v210_v27  ;;  %v488_v27 = vld [vmem:[#allocation9 + $0x188] sm:$0xff] }
  0x70   :  { %395 = vmatpush1.msra.mxu0 %v209_v29  ;;  %v472_v29 = vld [vmem:[#allocation9 + $0x108] sm:$0xff] }
  0x71   :  { %715 = vmatprep.subr.mxu0 %v502_v31  ;;  %v487_v31 = vld [vmem:[#allocation9 + $0x180] sm:$0xff] }
 0x111   :  { %v203_v33 = vpop.f32.mrf.mxu0 }
 0x112   :  { %v204_v34 = vadd.f32 %v668_v32, %v203_v33  ;;  %v439_v32 = vld [vmem:[#allocation9] sm:$0xff] }
 0x113   :  { %v768_v37 = vpop.f32.mrf.mxu0  ;;  %v471_v33 = vld [vmem:[#allocation9 + $0x100] sm:$0xff] }
 0x114   :  { %358 = vmatmul.mubr.f32.vlgmr.msra.gmra.mxu1 %v204_v34  ;;  %429 = vmatmul.mubr.f32.vlgmr.msra.gmra.mxu0 %v204_v34  ;;  %v273_v34 = vlaneseq }
 0x115   :  { %681 = vmatpush3.msra.mxu1 %v454_v35  ;;  %716 = vmatpush3.msra.mxu0 %v486_v36 }
 0x116   :  { %682 = vmatprep.subr.mxu1 %v469_v38  ;;  %717 = vmatprep.subr.mxu0 %v501_v39  ;;  %v274_v35 = vshrl.u32 %v273_v34, 7  ;;  %v271_v38 = vld [vmem:[%s993_s4] sm:$0xf] }
 0x117   :  { %683 = vmatpush3.msra.mxu1 %v453_v40  ;;  %718 = vmatpush3.msra.mxu0 %v485_v41 }
 0x118   :  { %684 = vmatprep.subr.mxu1 %v468_v42  ;;  %719 = vmatprep.subr.mxu0 %v500_v43  ;;  %v275_v36 = vsub.s32 0, %v274_v35  ;;  %v283_v37 = vsub.s32 2, %v274_v35  ;;  %v279_v39 = vsub.s32 1, %v274_v35  ;;  %v287_v40 = vsub.s32 3, %v274_v35 }
 0x119   :  { %685 = vmatpush3.msra.mxu1 %v452_v44  ;;  %720 = vmatpush3.msra.mxu0 %v484_v45 }
 0x11a   :  { %686 = vmatprep.subr.mxu1 %v467_v46  ;;  %721 = vmatprep.subr.mxu0 %v499_v47  ;;  %v276_v41 = vrot.slane %v271_v38, %v275_v36  ;;  %v284_v42 = vrot.slane %v271_v38, %v283_v37  ;;  %v280_v43 = vrot.slane %v271_v38, %v279_v39 }
 0x11b   :  { %687 = vmatpush3.msra.mxu1 %v451_v48  ;;  %722 = vmatpush3.msra.mxu0 %v483_v49  ;;  %v288_v44 = vrot.slane %v271_v38, %v287_v40 }
 0x11c   :  { %688 = vmatprep.subr.mxu1 %v466_v50  ;;  %723 = vmatprep.subr.mxu0 %v498_v51 }
 0x11d   :  { %689 = vmatpush3.msra.mxu1 %v450_v52  ;;  %724 = vmatpush3.msra.mxu0 %v482_v53 }
 0x11e   :  { %690 = vmatprep.subr.mxu1 %v465_v54  ;;  %725 = vmatprep.subr.mxu0 %v497_v55 }
 0x11f   :  { %691 = vmatpush3.msra.mxu1 %v449_v56  ;;  %726 = vmatpush3.msra.mxu0 %v481_v57 }
 0x120   :  { %692 = vmatprep.subr.mxu1 %v464_v58  ;;  %727 = vmatprep.subr.mxu0 %v496_v59  ;;  %v670_v59 = vld [vmem:[%s995_s6] ss:$0 sm:$0xff] }
 0x121   :  { %693 = vmatpush3.msra.mxu1 %v448_v60  ;;  %728 = vmatpush3.msra.mxu0 %v480_v61 }
 0x122   :  { %694 = vmatprep.subr.mxu1 %v463_v62  ;;  %729 = vmatprep.subr.mxu0 %v495_v63 }
 0x123   :  { %695 = vmatpush3.msra.mxu1 %v447_v1  ;;  %730 = vmatpush3.msra.mxu0 %v479_v2 }
 0x124   :  { %696 = vmatprep.subr.mxu1 %v462_v3  ;;  %731 = vmatprep.subr.mxu0 %v494_v4 }
 0x125   :  { %697 = vmatpush3.msra.mxu1 %v446_v5  ;;  %732 = vmatpush3.msra.mxu0 %v478_v6 }
 0x126   :  { %698 = vmatprep.subr.mxu1 %v461_v7  ;;  %733 = vmatprep.subr.mxu0 %v493_v8 }
 0x127   :  { %699 = vmatpush3.msra.mxu1 %v445_v9  ;;  %734 = vmatpush3.msra.mxu0 %v477_v10 }
 0x128   :  { %700 = vmatprep.subr.mxu1 %v460_v11  ;;  %735 = vmatprep.subr.mxu0 %v492_v0 }
 0x129   :  { %701 = vmatpush3.msra.mxu1 %v444_v12  ;;  %736 = vmatpush3.msra.mxu0 %v476_v13 }
 0x12a   :  { %702 = vmatprep.subr.mxu1 %v459_v14  ;;  %737 = vmatprep.subr.mxu0 %v491_v15 }
 0x12b   :  { %703 = vmatpush3.msra.mxu1 %v443_v16  ;;  %738 = vmatpush3.msra.mxu0 %v475_v17 }
 0x12c   :  { %704 = vmatprep.subr.mxu1 %v458_v18  ;;  %739 = vmatprep.subr.mxu0 %v490_v19 }
 0x12d   :  { %705 = vmatpush3.msra.mxu1 %v442_v20  ;;  %740 = vmatpush3.msra.mxu0 %v474_v21 }
 0x12e   :  { %706 = vmatprep.subr.mxu1 %v457_v22  ;;  %741 = vmatprep.subr.mxu0 %v489_v23 }
 0x12f   :  { %707 = vmatpush3.msra.mxu1 %v441_v24  ;;  %742 = vmatpush3.msra.mxu0 %v473_v25 }
 0x130   :  { %708 = vmatprep.subr.mxu1 %v456_v26  ;;  %743 = vmatprep.subr.mxu0 %v488_v27 }
 0x131   :  { %709 = vmatpush3.msra.mxu1 %v440_v28  ;;  %744 = vmatpush3.msra.mxu0 %v472_v29 }
 0x132   :  { %710 = vmatprep.subr.mxu1 %v455_v30  ;;  %745 = vmatprep.subr.mxu0 %v487_v31 }
 0x133   :  { %711 = vmatpush3.msra.mxu1 %v439_v32  ;;  %746 = vmatpush3.msra.mxu0 %v471_v33 }
 0x1d4   :  { %v359_v45 = vpop.f32.mrf.mxu1  ;;  %v430_v46 = vpop.f32.mrf.mxu0 }
 0x1d5   :  { %v360_v47 = vadd.f32 %v359_v45, %v276_v41  ;;  %v431_v48 = vadd.f32 %v430_v46, %v284_v42 }
 0x1d6   :  { %v361_v49 = vpop.f32.mrf.mxu1  ;;  %v432_v50 = vpop.f32.mrf.mxu0 }
 0x1d7   :  { %v362_v51 = vadd.f32 %v361_v49, %v280_v43  ;;  %v433_v52 = vadd.f32 %v432_v50, %v288_v44  ;;  %v435_v55 = vmax.f32 %v360_v47, 0.0  ;;  %v437_v56 = vmax.f32 %v431_v48, 0.0 }
 0x1d9   :  { %v436_v53 = vmax.f32 %v362_v51, 0.0  ;;  %v438_v54 = vmax.f32 %v433_v52, 0.0 }
 0x1db   :  { %574 = vmatprep.mubr.f32.mxu1 %v436_v53  ;;  %644 = vmatprep.mubr.f32.mxu0 %v438_v54 }
 0x1dc   :  { %575 = vmatmul.mubr.f32.vlgmr.msra.gmra.mxu1 %v435_v55  ;;  %645 = vmatmul.mubr.f32.vlgmr.msra.gmra.mxu0 %v437_v56 }
 0x29c   :  { %v712_v57 = vpop.f32.mrf.mxu1  ;;  %v747_v58 = vpop.f32.mrf.mxu0 }
 0x29e   :  { %v713_v60 = vpop.f32.mrf.mxu1  ;;  %v748_v61 = vpop.f32.mrf.mxu0 }
 0x29f   :  { %v714_v62 = vadd.f32 %v713_v60, %v712_v57  ;;  %v749_v1 = vadd.f32 %v748_v61, %v747_v58 }
 0x2a1   :  { %v577_v63 = vadd.f32 %v714_v62, %v670_v59 }
 0x2a3   :  { %v647_v2 = vadd.f32 %v749_v1, %v577_v63 }
 0x2a5   :  { %650 = vst [vmem:[#allocation11] sm:$0x3] %v647_v2 }
 0x2a6   :  { %871 = shalt.err (!%p868_p10)
}
 0x2a7   :  { %660 = dma.vmem_to_hbm [thread:$0]  %s658_s26, 32, %s996_s7, [#allocation5]  }
 0x2a8   :  { %886 = dma.done.wait [#allocation5], 32  }
 0x2a9   :  { %887 = vsyncadd [#allocation5], 4294967264 }
 0x2aa   :  { %664 = vsyncpa [#allocation4], 1 }
 0x2ab   :  { %665 = vsyncpa [#allocation7], 1 }
 0x2ac   :  { %666 = vsyncpa [#allocation10], 1 }
 0x2ad   :  { %667 = vsyncpa [#allocation5], 1 }

// kernel: tpu_custom_call.1
= control target key start
LH: loop header
LB: loop body
LE: loop exit
PB: predicated region body
PF: predicated region fallthrough
CT: control target
= control target key end

     0   :  { %12 = vsyncpa [#allocation4], 0  ;;  %s989_s0 = inlined_call_operand.hbm [shape: f32[2,8,64], index: 0, kind: input, shape index: {}]   ;;  %s990_s1 = inlined_call_operand.hbm [shape: f32[64,128], index: 1, kind: input, shape index: {}]   ;;  %s991_s2 = inlined_call_operand.vmem [shape: f32[1,128], index: 2, kind: input, shape index: {}]   ;;  %s992_s3 = inlined_call_operand.hbm [shape: f32[128,512], index: 3, kind: input, shape index: {}]   ;;  %s993_s4 = inlined_call_operand.vmem [shape: f32[1,512], index: 4, kind: input, shape index: {}]   ;;  %s994_s5 = inlined_call_operand.hbm [shape: f32[512,128], index: 5, kind: input, shape index: {}]   ;;  %s995_s6 = inlined_call_operand.vmem [shape: f32[1,128], index: 6, kind: input, shape index: {}]   ;;  %s996_s7 = inlined_call_operand.hbm [shape: f32[2,128], index: 7, kind: output, shape index: {}]  }
   0x1   :  { %13 = vsyncpa [#allocation7], 0 }
   0x2   :  { %14 = vsyncpa [#allocation10], 0 }
   0x3   :  { %15 = vsyncpa [#allocation5], 0  ;;  %s888_s24 = smov [#allocation6]   ;;  %s889_s26 = smov [#allocation3]  }
   0x4   :  { %s33_s25 = sshll.u32 %s888_s24, 4  ;;  %s21_s27 = sshll.u32 %s889_s26, 4  ;;  %s34_s25 = int_to_ptr.vmem [resolvable:$true] %s33_s25  ;;  %s22_s27 = int_to_ptr.vmem [resolvable:$true] %s21_s27 }
   0x5   :  { %s788_s28 = scalar_lea.vmem %s34_s25, 1024  ;;  %p793_p1 = scmp.lt.s32.totalorder %s34_s25, %s34_s25 }
   0x6   :  { %p789_p0 = scmp.ne.s32.totalorder %s34_s25, %s788_s28  ;;  %p794_p2 = scmp.lt.s32.totalorder %s788_s28, %s788_s28 }
   0x8   :  { %p795_p3 = por %p794_p2, %p793_p1 }
   0xa   :  { %p796_p4 = pnand %p795_p3, %p789_p0 }
   0xc   :  { %799 = shalt.err (!%p796_p4)
}
   0xd   :  { %s890_s29 = smov 128   ;;  %s891_s30 = smov 8  }
   0xe   :  { %39 = dma.hbm_to_vmem [thread:$0]  %s990_s1, 1024, %s34_s25, [#allocation7], %s890_s29, %s890_s29, %s891_s30  }
   0xf   :  { %s808_s10 = scalar_lea.vmem %s22_s27, 256  ;;  %p813_p6 = scmp.lt.s32.totalorder %s22_s27, %s22_s27 }
  0x10   :  { %p809_p5 = scmp.ne.s32.totalorder %s22_s27, %s808_s10  ;;  %p814_p7 = scmp.lt.s32.totalorder %s808_s10, %s808_s10 }
  0x12   :  { %p815_p8 = por %p814_p7, %p813_p6 }
  0x14   :  { %p816_p9 = pnand %p815_p8, %p809_p5 }
  0x16   :  { %819 = shalt.err (!%p816_p9)
}
  0x17   :  { %27 = dma.hbm_to_vmem [thread:$0]  %s989_s0, 256, %s22_s27, [#allocation4], %s890_s29, %s890_s29, %s891_s30  }
  0x18   :  { %s892_s13 = smov [#allocation8]  }
  0x19   :  { %s47_s14 = sshll.u32 %s892_s13, 4  ;;  %s48_s14 = int_to_ptr.vmem [resolvable:$true] %s47_s14 }
  0x1a   :  { %s828_s15 = scalar_lea.vmem %s48_s14, 8192  ;;  %p833_p11 = scmp.lt.s32.totalorder %s48_s14, %s48_s14 }
  0x1b   :  { %p829_p10 = scmp.ne.s32.totalorder %s48_s14, %s828_s15  ;;  %p834_p12 = scmp.lt.s32.totalorder %s828_s15, %s828_s15 }
  0x1d   :  { %p835_p13 = por %p834_p12, %p833_p11 }
  0x1f   :  { %p836_p0 = pnand %p835_p13, %p829_p10 }
  0x21   :  { %839 = shalt.err (!%p836_p0)
}
  0x22   :  { %s893_s1 = smov 512   ;;  %s894_s16 = smov 32  }
  0x23   :  { %53 = dma.hbm_to_vmem [thread:$0]  %s992_s3, 8192, %s48_s14, [#allocation7], %s893_s1, %s893_s1, %s894_s16  }
  0x24   :  { %s895_s19 = smov [#allocation9]  }
  0x25   :  { %s61_s20 = sshll.u32 %s895_s19, 4  ;;  %s62_s20 = int_to_ptr.vmem [resolvable:$true] %s61_s20 }
  0x26   :  { %s848_s0 = scalar_lea.vmem %s62_s20, 8192  ;;  %p853_p2 = scmp.lt.s32.totalorder %s62_s20, %s62_s20 }
  0x27   :  { %p849_p1 = scmp.ne.s32.totalorder %s62_s20, %s848_s0  ;;  %p854_p3 = scmp.lt.s32.totalorder %s848_s0, %s848_s0 }
  0x29   :  { %p855_p4 = por %p854_p3, %p853_p2 }
  0x2b   :  { %p856_p5 = pnand %p855_p4, %p849_p1 }
  0x2d   :  { %859 = shalt.err (!%p856_p5)
}
  0x2e   :  { %67 = dma.hbm_to_vmem [thread:$0]  %s994_s5, 8192, %s62_s20, [#allocation10], %s890_s29, %s890_s29, %s891_s30  }
  0x2f   :  { %880 = dma.done.wait [#allocation4], 256  }
  0x30   :  { %881 = vsyncadd [#allocation4], 4294967040 }
  0x31   :  { %882 = dma.done.wait [#allocation7], 9216  }
  0x32   :  { %883 = vsyncadd [#allocation7], 4294958080 }
  0x33   :  { %884 = dma.done.wait [#allocation10], 8192  }
  0x34   :  { %885 = vsyncadd [#allocation10], 4294959104  ;;  %vm86_vm0 = vcmask 517120   ;;  %v896_v0 = vmov 0.0   ;;  %vm897_vm1 = vmmov 0   ;;  %v126_v1 = vld [vmem:[#allocation6 + $0x38] sm:$0xff] }
  0x35   :  { %750 = vmatprep.subr.mxu0 %v896_v0  ;;  %766 = vmatprep.mubr.msk.f32.mxu0 %vm897_vm1, %v896_v0  ;;  %87 = vst.msk [vmem:[#allocation2] sm:$0x3] %vm86_vm0, %v896_v0  ;;  %v125_v2 = vld [vmem:[#allocation6 + $0x30] sm:$0xff]  ;;  %vm91_vm2 = vcmask 523264   ;;  %v124_v3 = vld [vmem:[#allocation6 + $0x28] sm:$0xff]  ;;  %v89_v5 = vld [vmem:[#allocation3 + $0x8] sm:$0xff] }
  0x36   :  { %357 = vmatprep.mubr.f32.mxu1 %v896_v0  ;;  %751 = vmatpush3.msra.mxu0 %v126_v1  ;;  %v88_v4 = vld [vmem:[#allocation3] sm:$0xff]  ;;  %v268_v7 = vld [vmem:[#allocation8 + $0x1e8] sm:$0xff]  ;;  %v123_v8 = vld [vmem:[#allocation6 + $0x20] sm:$0xff]  ;;  %v99_v10 = vsel %vm91_vm2, %v89_v5, 0.0  ;;  %vm108_vm3 = vcmask 1041409   ;;  %s898_s25 = smov [#allocation11]  }
  0x37   :  { %752 = vmatprep.subr.mxu0 %v896_v0  ;;  %v92_v6 = vsel %vm91_vm2, %v88_v4, 0.0  ;;  %293 = vmatprep.subr.mxu1 %v268_v7  ;;  %v267_v11 = vld [vmem:[#allocation8 + $0x1e0] sm:$0xff]  ;;  %v100_v12 = vrot.slane %v99_v10, 4  ;;  %v264_v13 = vld [vmem:[#allocation8 + $0x1c8] sm:$0xff]  ;;  %v122_v15 = vld [vmem:[#allocation6 + $0x18] sm:$0xff]  ;;  %s657_s26 = sshll.u32 %s898_s25, 4  ;;  %s658_s26 = int_to_ptr.vmem [resolvable:$true] %s657_s26 }
  0x38   :  { %753 = vmatpush3.msra.mxu0 %v125_v2  ;;  %v93_v9 = vrot.slane %v92_v6, 4  ;;  %294 = vmatpush1.msra.mxu1 %v267_v11  ;;  %v263_v14 = vld [vmem:[#allocation8 + $0x1c0] sm:$0xff]  ;;  %v260_v17 = vld [vmem:[#allocation8 + $0x1a8] sm:$0xff]  ;;  %v121_v21 = vld [vmem:[#allocation6 + $0x10] sm:$0xff]  ;;  %s860_s27 = scalar_lea.vmem %s658_s26, 32  ;;  %p865_p7 = scmp.lt.s32.totalorder %s658_s26, %s658_s26 }
  0x39   :  { %754 = vmatprep.subr.mxu0 %v896_v0  ;;  %295 = vmatprep.subr.mxu1 %v264_v13  ;;  %v101_v18 = vadd.f32 %v100_v12, %v99_v10  ;;  %v259_v19 = vld [vmem:[#allocation8 + $0x1a0] sm:$0xff]  ;;  %v256_v20 = vld [vmem:[#allocation8 + $0x188] sm:$0xff]  ;;  %v270_v35 = vld [vmem:[#allocation8 + $0x1f8] sm:$0xff]  ;;  %p861_p6 = scmp.ne.s32.totalorder %s658_s26, %s860_s27  ;;  %p866_p8 = scmp.lt.s32.totalorder %s860_s27, %s860_s27 }
  0x3a   :  { %755 = vmatpush3.msra.mxu0 %v124_v3  ;;  %v94_v16 = vadd.f32 %v93_v9, %v92_v6  ;;  %296 = vmatpush1.msra.mxu1 %v263_v14  ;;  %v255_v23 = vld [vmem:[#allocation8 + $0x180] sm:$0xff]  ;;  %v252_v25 = vld [vmem:[#allocation8 + $0x168] sm:$0xff]  ;;  %v269_v58 = vld [vmem:[#allocation8 + $0x1f0] sm:$0xff] }
  0x3b   :  { %756 = vmatprep.subr.mxu0 %v896_v0  ;;  %297 = vmatprep.subr.mxu1 %v260_v17  ;;  %v102_v24 = vrot.slane %v101_v18, 2  ;;  %v120_v26 = vld [vmem:[#allocation6 + $0x8] sm:$0xff]  ;;  %v251_v28 = vld [vmem:[#allocation8 + $0x160] sm:$0xff]  ;;  %v266_v60 = vld [vmem:[#allocation8 + $0x1d8] sm:$0xff]  ;;  %p867_p9 = por %p866_p8, %p865_p7 }
  0x3c   :  { %757 = vmatpush3.msra.mxu0 %v123_v8  ;;  %v95_v22 = vrot.slane %v94_v16, 2  ;;  %298 = vmatpush1.msra.mxu1 %v259_v19  ;;  %v248_v30 = vld [vmem:[#allocation8 + $0x148] sm:$0xff]  ;;  %v119_v31 = vld [vmem:[#allocation6] sm:$0xff]  ;;  %v265_v62 = vld [vmem:[#allocation8 + $0x1d0] sm:$0xff] }
  0x3d   :  { %758 = vmatprep.subr.mxu0 %v896_v0  ;;  %299 = vmatprep.subr.mxu1 %v256_v20  ;;  %v103_v29 = vadd.f32 %v102_v24, %v101_v18  ;;  %v247_v33 = vld [vmem:[#allocation8 + $0x140] sm:$0xff]  ;;  %v244_v36 = vld [vmem:[#allocation8 + $0x128] sm:$0xff]  ;;  %v262_v63 = vld [vmem:[#allocation8 + $0x1b8] sm:$0xff]  ;;  %p868_p10 = pnand %p867_p9, %p861_p6 }
  0x3e   :  { %759 = vmatpush3.msra.mxu0 %v122_v15  ;;  %v96_v27 = vadd.f32 %v95_v22, %v94_v16  ;;  %300 = vmatpush1.msra.mxu1 %v255_v23  ;;  %v243_v38 = vld [vmem:[#allocation8 + $0x120] sm:$0xff]  ;;  %v90_v39 = vld [vmem:[#allocation2] sm:$0x3]  ;;  %v261_v1 = vld [vmem:[#allocation8 + $0x1b0] sm:$0xff] }
  0x3f   :  { %760 = vmatprep.subr.mxu0 %v896_v0  ;;  %301 = vmatprep.subr.mxu1 %v252_v25  ;;  %v104_v34 = vrot.slane %v103_v29, 1  ;;  %v240_v41 = vld [vmem:[#allocation8 + $0x108] sm:$0xff]  ;;  %v239_v42 = vld [vmem:[#allocation8 + $0x100] sm:$0xff]  ;;  %v258_v2 = vld [vmem:[#allocation8 + $0x198] sm:$0xff] }
  0x40   :  { %761 = vmatpush3.msra.mxu0 %v121_v21  ;;  %v97_v32 = vrot.slane %v96_v27, 1  ;;  %302 = vmatpush1.msra.mxu1 %v251_v28  ;;  %v236_v44 = vld [vmem:[#allocation8 + $0xe8] sm:$0xff]  ;;  %v235_v46 = vld [vmem:[#allocation8 + $0xe0] sm:$0xff]  ;;  %v257_v3 = vld [vmem:[#allocation8 + $0x190] sm:$0xff] }
  0x41   :  { %762 = vmatprep.subr.mxu0 %v896_v0  ;;  %303 = vmatprep.subr.mxu1 %v248_v30  ;;  %v105_v40 = vadd.f32 %v104_v34, %v103_v29  ;;  %v232_v47 = vld [vmem:[#allocation8 + $0xc8] sm:$0xff]  ;;  %v231_v48 = vld [vmem:[#allocation8 + $0xc0] sm:$0xff]  ;;  %v254_v4 = vld [vmem:[#allocation8 + $0x178] sm:$0xff] }
  0x42   :  { %763 = vmatpush3.msra.mxu0 %v120_v26  ;;  %v98_v37 = vadd.f32 %v97_v32, %v96_v27  ;;  %304 = vmatpush1.msra.mxu1 %v247_v33  ;;  %v228_v49 = vld [vmem:[#allocation8 + $0xa8] sm:$0xff]  ;;  %v227_v50 = vld [vmem:[#allocation8 + $0xa0] sm:$0xff]  ;;  %v253_v5 = vld [vmem:[#allocation8 + $0x170] sm:$0xff] }
  0x43   :  { %764 = vmatprep.subr.mxu0 %v896_v0  ;;  %305 = vmatprep.subr.mxu1 %v244_v36  ;;  %v224_v51 = vld [vmem:[#allocation8 + $0x88] sm:$0xff]  ;;  %v223_v52 = vld [vmem:[#allocation8 + $0x80] sm:$0xff]  ;;  %v250_v6 = vld [vmem:[#allocation8 + $0x158] sm:$0xff] }
  0x44   :  { %765 = vmatpush3.msra.mxu0 %v119_v31  ;;  %v109_v43 = vsel %vm108_vm3, %v105_v40, %v98_v37  ;;  %306 = vmatpush1.msra.mxu1 %v243_v38  ;;  %v220_v53 = vld [vmem:[#allocation8 + $0x68] sm:$0xff]  ;;  %v219_v54 = vld [vmem:[#allocation8 + $0x60] sm:$0xff]  ;;  %v249_v7 = vld [vmem:[#allocation8 + $0x150] sm:$0xff] }
  0x45   :  { %364 = vmatprep.subr.mxu0 %v270_v35  ;;  %v111_v45 = vadd.f32 %v109_v43, %v90_v39  ;;  %307 = vmatprep.subr.mxu1 %v240_v41  ;;  %v216_v56 = vld [vmem:[#allocation8 + $0x48] sm:$0xff]  ;;  %v215_v59 = vld [vmem:[#allocation8 + $0x40] sm:$0xff]  ;;  %v246_v8 = vld [vmem:[#allocation8 + $0x138] sm:$0xff] }
  0x46   :  { %308 = vmatpush1.msra.mxu1 %v239_v42  ;;  %v212_v61 = vld [vmem:[#allocation8 + $0x28] sm:$0xff]  ;;  %v245_v9 = vld [vmem:[#allocation8 + $0x130] sm:$0xff]  ;;  %v242_v10 = vld [vmem:[#allocation8 + $0x118] sm:$0xff] }
  0x47   :  { %113 = vst.msk [vmem:[#allocation2] sm:$0x3] %vm86_vm0, %v111_v45  ;;  %309 = vmatprep.subr.mxu1 %v236_v44  ;;  %v241_v11 = vld [vmem:[#allocation8 + $0x110] sm:$0xff]  ;;  %v234_v13 = vld [vmem:[#allocation8 + $0xd8] sm:$0xff]  ;;  %v211_v24 = vld [vmem:[#allocation8 + $0x20] sm:$0xff] }
  0x48   :  { %310 = vmatpush1.msra.mxu1 %v235_v46  ;;  %v237_v12 = vld [vmem:[#allocation8 + $0xf0] sm:$0xff]  ;;  %v230_v15 = vld [vmem:[#allocation8 + $0xb8] sm:$0xff]  ;;  %v208_v26 = vld [vmem:[#allocation8 + $0x8] sm:$0xff] }
  0x49   :  { %311 = vmatprep.subr.mxu1 %v232_v47  ;;  %v233_v14 = vld [vmem:[#allocation8 + $0xd0] sm:$0xff]  ;;  %v226_v17 = vld [vmem:[#allocation8 + $0x98] sm:$0xff]  ;;  %v207_v28 = vld [vmem:[#allocation8] sm:$0xff] }
  0x4a   :  { %312 = vmatpush1.msra.mxu1 %v231_v48  ;;  %v229_v16 = vld [vmem:[#allocation8 + $0xb0] sm:$0xff]  ;;  %v222_v19 = vld [vmem:[#allocation8 + $0x78] sm:$0xff]  ;;  %v668_v32 = vld [vmem:[%s991_s2] ss:$0 sm:$0xff] }
  0x4b   :  { %313 = vmatprep.subr.mxu1 %v228_v49  ;;  %v225_v18 = vld [vmem:[#allocation8 + $0x90] sm:$0xff]  ;;  %v218_v21 = vld [vmem:[#allocation8 + $0x58] sm:$0xff]  ;;  %v468_v42 = vld [vmem:[#allocation9 + $0xe8] sm:$0xff] }
  0x4c   :  { %314 = vmatpush1.msra.mxu1 %v227_v50  ;;  %v221_v20 = vld [vmem:[#allocation8 + $0x70] sm:$0xff]  ;;  %v214_v23 = vld [vmem:[#allocation8 + $0x38] sm:$0xff]  ;;  %v500_v43 = vld [vmem:[#allocation9 + $0x1e8] sm:$0xff] }
  0x4d   :  { %315 = vmatprep.subr.mxu1 %v224_v51  ;;  %v217_v22 = vld [vmem:[#allocation8 + $0x50] sm:$0xff]  ;;  %v210_v27 = vld [vmem:[#allocation8 + $0x18] sm:$0xff]  ;;  %v452_v44 = vld [vmem:[#allocation9 + $0x68] sm:$0xff] }
  0x4e   :  { %v117_v55 = vld [vmem:[#allocation2] sm:$0x3]  ;;  %316 = vmatpush1.msra.mxu1 %v223_v52  ;;  %v213_v25 = vld [vmem:[#allocation8 + $0x30] sm:$0xff]  ;;  %v470_v30 = vld [vmem:[#allocation9 + $0xf8] sm:$0xff] }
  0x4f   :  { %v118_v57 = vmul.f32 0.125, %v117_v55  ;;  %317 = vmatprep.subr.mxu1 %v220_v53  ;;  %v209_v29 = vld [vmem:[#allocation8 + $0x10] sm:$0xff]  ;;  %v502_v31 = vld [vmem:[#allocation9 + $0x1f8] sm:$0xff]  ;;  %v484_v45 = vld [vmem:[#allocation9 + $0x168] sm:$0xff] }
  0x50   :  { %318 = vmatpush1.msra.mxu1 %v219_v54  ;;  %v454_v35 = vld [vmem:[#allocation9 + $0x78] sm:$0xff]  ;;  %v469_v38 = vld [vmem:[#allocation9 + $0xf0] sm:$0xff]  ;;  %v467_v46 = vld [vmem:[#allocation9 + $0xe0] sm:$0xff] }
  0x51   :  { %767 = vmatmul.mubr.msk.f32.vlgmr.msra.gmra.mxu0 %vm91_vm2, %v118_v57  ;;  %319 = vmatprep.subr.mxu1 %v216_v56  ;;  %v486_v36 = vld [vmem:[#allocation9 + $0x178] sm:$0xff]  ;;  %v501_v39 = vld [vmem:[#allocation9 + $0x1f0] sm:$0xff]  ;;  %v499_v47 = vld [vmem:[#allocation9 + $0x1e0] sm:$0xff] }
  0x52   :  { %365 = vmatpush1.msra.mxu0 %v269_v58  ;;  %320 = vmatpush1.msra.mxu1 %v215_v59  ;;  %v453_v40 = vld [vmem:[#allocation9 + $0x70] sm:$0xff]  ;;  %v451_v48 = vld [vmem:[#allocation9 + $0x60] sm:$0xff]  ;;  %v466_v50 = vld [vmem:[#allocation9 + $0xd8] sm:$0xff] }
  0x53   :  { %366 = vmatprep.subr.mxu0 %v266_v60  ;;  %321 = vmatprep.subr.mxu1 %v212_v61  ;;  %v485_v41 = vld [vmem:[#allocation9 + $0x170] sm:$0xff]  ;;  %v483_v49 = vld [vmem:[#allocation9 + $0x160] sm:$0xff]  ;;  %v498_v51 = vld [vmem:[#allocation9 + $0x1d8] sm:$0xff] }
  0x54   :  { %367 = vmatpush1.msra.mxu0 %v265_v62  ;;  %428 = vmatprep.mubr.f32.mxu0 %v896_v0  ;;  %v238_v0 = vld [vmem:[#allocation8 + $0xf8] sm:$0xff]  ;;  %v465_v54 = vld [vmem:[#allocation9 + $0xd0] sm:$0xff]  ;;  %v464_v58 = vld [vmem:[#allocation9 + $0xc8] sm:$0xff] }
  0x55   :  { %368 = vmatprep.subr.mxu0 %v262_v63  ;;  %322 = vmatpush1.msra.mxu1 %v211_v24  ;;  %v450_v52 = vld [vmem:[#allocation9 + $0x58] sm:$0xff]  ;;  %v497_v55 = vld [vmem:[#allocation9 + $0x1d0] sm:$0xff]  ;;  %v496_v59 = vld [vmem:[#allocation9 + $0x1c8] sm:$0xff] }
  0x56   :  { %369 = vmatpush1.msra.mxu0 %v261_v1  ;;  %323 = vmatprep.subr.mxu1 %v208_v26  ;;  %v482_v53 = vld [vmem:[#allocation9 + $0x158] sm:$0xff]  ;;  %v449_v56 = vld [vmem:[#allocation9 + $0x50] sm:$0xff]  ;;  %v448_v60 = vld [vmem:[#allocation9 + $0x48] sm:$0xff] }
  0x57   :  { %370 = vmatprep.subr.mxu0 %v258_v2  ;;  %324 = vmatpush1.msra.mxu1 %v207_v28  ;;  %v481_v57 = vld [vmem:[#allocation9 + $0x150] sm:$0xff]  ;;  %v480_v61 = vld [vmem:[#allocation9 + $0x148] sm:$0xff]  ;;  %v463_v62 = vld [vmem:[#allocation9 + $0xc0] sm:$0xff] }
  0x58   :  { %371 = vmatpush1.msra.mxu0 %v257_v3  ;;  %680 = vmatprep.subr.mxu1 %v470_v30  ;;  %v495_v63 = vld [vmem:[#allocation9 + $0x1c0] sm:$0xff]  ;;  %v462_v3 = vld [vmem:[#allocation9 + $0xb8] sm:$0xff]  ;;  %v441_v24 = vld [vmem:[#allocation9 + $0x10] sm:$0xff] }
  0x59   :  { %372 = vmatprep.subr.mxu0 %v254_v4  ;;  %v447_v1 = vld [vmem:[#allocation9 + $0x40] sm:$0xff]  ;;  %v494_v4 = vld [vmem:[#allocation9 + $0x1b8] sm:$0xff]  ;;  %v456_v26 = vld [vmem:[#allocation9 + $0x88] sm:$0xff] }
  0x5a   :  { %373 = vmatpush1.msra.mxu0 %v253_v5  ;;  %v479_v2 = vld [vmem:[#allocation9 + $0x140] sm:$0xff]  ;;  %v446_v5 = vld [vmem:[#allocation9 + $0x38] sm:$0xff]  ;;  %v440_v28 = vld [vmem:[#allocation9 + $0x8] sm:$0xff] }
  0x5b   :  { %374 = vmatprep.subr.mxu0 %v250_v6  ;;  %v478_v6 = vld [vmem:[#allocation9 + $0x138] sm:$0xff]  ;;  %v455_v30 = vld [vmem:[#allocation9 + $0x80] sm:$0xff] }
  0x5c   :  { %375 = vmatpush1.msra.mxu0 %v249_v7  ;;  %v461_v7 = vld [vmem:[#allocation9 + $0xb0] sm:$0xff] }
  0x5d   :  { %376 = vmatprep.subr.mxu0 %v246_v8  ;;  %v493_v8 = vld [vmem:[#allocation9 + $0x1b0] sm:$0xff] }
  0x5e   :  { %377 = vmatpush1.msra.mxu0 %v245_v9  ;;  %v445_v9 = vld [vmem:[#allocation9 + $0x30] sm:$0xff] }
  0x5f   :  { %378 = vmatprep.subr.mxu0 %v242_v10  ;;  %v477_v10 = vld [vmem:[#allocation9 + $0x130] sm:$0xff] }
  0x60   :  { %379 = vmatpush1.msra.mxu0 %v241_v11  ;;  %v460_v11 = vld [vmem:[#allocation9 + $0xa8] sm:$0xff] }
  0x61   :  { %380 = vmatprep.subr.mxu0 %v238_v0  ;;  %v492_v0 = vld [vmem:[#allocation9 + $0x1a8] sm:$0xff] }
  0x62   :  { %381 = vmatpush1.msra.mxu0 %v237_v12  ;;  %v444_v12 = vld [vmem:[#allocation9 + $0x28] sm:$0xff] }
  0x63   :  { %382 = vmatprep.subr.mxu0 %v234_v13  ;;  %v476_v13 = vld [vmem:[#allocation9 + $0x128] sm:$0xff] }
  0x64   :  { %383 = vmatpush1.msra.mxu0 %v233_v14  ;;  %v459_v14 = vld [vmem:[#allocation9 + $0xa0] sm:$0xff] }
  0x65   :  { %384 = vmatprep.subr.mxu0 %v230_v15  ;;  %v491_v15 = vld [vmem:[#allocation9 + $0x1a0] sm:$0xff] }
  0x66   :  { %385 = vmatpush1.msra.mxu0 %v229_v16  ;;  %v443_v16 = vld [vmem:[#allocation9 + $0x20] sm:$0xff] }
  0x67   :  { %386 = vmatprep.subr.mxu0 %v226_v17  ;;  %v475_v17 = vld [vmem:[#allocation9 + $0x120] sm:$0xff] }
  0x68   :  { %387 = vmatpush1.msra.mxu0 %v225_v18  ;;  %v458_v18 = vld [vmem:[#allocation9 + $0x98] sm:$0xff] }
  0x69   :  { %388 = vmatprep.subr.mxu0 %v222_v19  ;;  %v490_v19 = vld [vmem:[#allocation9 + $0x198] sm:$0xff] }
  0x6a   :  { %389 = vmatpush1.msra.mxu0 %v221_v20  ;;  %v442_v20 = vld [vmem:[#allocation9 + $0x18] sm:$0xff] }
  0x6b   :  { %390 = vmatprep.subr.mxu0 %v218_v21  ;;  %v474_v21 = vld [vmem:[#allocation9 + $0x118] sm:$0xff] }
  0x6c   :  { %391 = vmatpush1.msra.mxu0 %v217_v22  ;;  %v457_v22 = vld [vmem:[#allocation9 + $0x90] sm:$0xff] }
  0x6d   :  { %392 = vmatprep.subr.mxu0 %v214_v23  ;;  %v489_v23 = vld [vmem:[#allocation9 + $0x190] sm:$0xff] }
  0x6e   :  { %393 = vmatpush1.msra.mxu0 %v213_v25  ;;  %v473_v25 = vld [vmem:[#allocation9 + $0x110] sm:$0xff] }
  0x6f   :  { %394 = vmatprep.subr.mxu0 %v210_v27  ;;  %v488_v27 = vld [vmem:[#allocation9 + $0x188] sm:$0xff] }
  0x70   :  { %395 = vmatpush1.msra.mxu0 %v209_v29  ;;  %v472_v29 = vld [vmem:[#allocation9 + $0x108] sm:$0xff] }
  0x71   :  { %715 = vmatprep.subr.mxu0 %v502_v31  ;;  %v487_v31 = vld [vmem:[#allocation9 + $0x180] sm:$0xff] }
 0x111   :  { %v203_v33 = vpop.f32.mrf.mxu0 }
 0x112   :  { %v204_v34 = vadd.f32 %v668_v32, %v203_v33  ;;  %v439_v32 = vld [vmem:[#allocation9] sm:$0xff] }
 0x113   :  { %v768_v37 = vpop.f32.mrf.mxu0  ;;  %v471_v33 = vld [vmem:[#allocation9 + $0x100] sm:$0xff] }
 0x114   :  { %358 = vmatmul.mubr.f32.vlgmr.msra.gmra.mxu1 %v204_v34  ;;  %429 = vmatmul.mubr.f32.vlgmr.msra.gmra.mxu0 %v204_v34  ;;  %v273_v34 = vlaneseq }
 0x115   :  { %681 = vmatpush3.msra.mxu1 %v454_v35  ;;  %716 = vmatpush3.msra.mxu0 %v486_v36 }
 0x116   :  { %682 = vmatprep.subr.mxu1 %v469_v38  ;;  %717 = vmatprep.subr.mxu0 %v501_v39  ;;  %v274_v35 = vshrl.u32 %v273_v34, 7  ;;  %v271_v38 = vld [vmem:[%s993_s4] sm:$0xf] }
 0x117   :  { %683 = vmatpush3.msra.mxu1 %v453_v40  ;;  %718 = vmatpush3.msra.mxu0 %v485_v41 }
 0x118   :  { %684 = vmatprep.subr.mxu1 %v468_v42  ;;  %719 = vmatprep.subr.mxu0 %v500_v43  ;;  %v275_v36 = vsub.s32 0, %v274_v35  ;;  %v283_v37 = vsub.s32 2, %v274_v35  ;;  %v279_v39 = vsub.s32 1, %v274_v35  ;;  %v287_v40 = vsub.s32 3, %v274_v35 }
 0x119   :  { %685 = vmatpush3.msra.mxu1 %v452_v44  ;;  %720 = vmatpush3.msra.mxu0 %v484_v45 }
 0x11a   :  { %686 = vmatprep.subr.mxu1 %v467_v46  ;;  %721 = vmatprep.subr.mxu0 %v499_v47  ;;  %v276_v41 = vrot.slane %v271_v38, %v275_v36  ;;  %v284_v42 = vrot.slane %v271_v38, %v283_v37  ;;  %v280_v43 = vrot.slane %v271_v38, %v279_v39 }
 0x11b   :  { %687 = vmatpush3.msra.mxu1 %v451_v48  ;;  %722 = vmatpush3.msra.mxu0 %v483_v49  ;;  %v288_v44 = vrot.slane %v271_v38, %v287_v40 }
 0x11c   :  { %688 = vmatprep.subr.mxu1 %v466_v50  ;;  %723 = vmatprep.subr.mxu0 %v498_v51 }
 0x11d   :  { %689 = vmatpush3.msra.mxu1 %v450_v52  ;;  %724 = vmatpush3.msra.mxu0 %v482_v53 }
 0x11e   :  { %690 = vmatprep.subr.mxu1 %v465_v54  ;;  %725 = vmatprep.subr.mxu0 %v497_v55 }
 0x11f   :  { %691 = vmatpush3.msra.mxu1 %v449_v56  ;;  %726 = vmatpush3.msra.mxu0 %v481_v57 }
 0x120   :  { %692 = vmatprep.subr.mxu1 %v464_v58  ;;  %727 = vmatprep.subr.mxu0 %v496_v59  ;;  %v670_v59 = vld [vmem:[%s995_s6] ss:$0 sm:$0xff] }
 0x121   :  { %693 = vmatpush3.msra.mxu1 %v448_v60  ;;  %728 = vmatpush3.msra.mxu0 %v480_v61 }
 0x122   :  { %694 = vmatprep.subr.mxu1 %v463_v62  ;;  %729 = vmatprep.subr.mxu0 %v495_v63 }
 0x123   :  { %695 = vmatpush3.msra.mxu1 %v447_v1  ;;  %730 = vmatpush3.msra.mxu0 %v479_v2 }
 0x124   :  { %696 = vmatprep.subr.mxu1 %v462_v3  ;;  %731 = vmatprep.subr.mxu0 %v494_v4 }
 0x125   :  { %697 = vmatpush3.msra.mxu1 %v446_v5  ;;  %732 = vmatpush3.msra.mxu0 %v478_v6 }
 0x126   :  { %698 = vmatprep.subr.mxu1 %v461_v7  ;;  %733 = vmatprep.subr.mxu0 %v493_v8 }
 0x127   :  { %699 = vmatpush3.msra.mxu1 %v445_v9  ;;  %734 = vmatpush3.msra.mxu0 %v477_v10 }
 0x128   :  { %700 = vmatprep.subr.mxu1 %v460_v11  ;;  %735 = vmatprep.subr.mxu0 %v492_v0 }
 0x129   :  { %701 = vmatpush3.msra.mxu1 %v444_v12  ;;  %736 = vmatpush3.msra.mxu0 %v476_v13 }
 0x12a   :  { %702 = vmatprep.subr.mxu1 %v459_v14  ;;  %737 = vmatprep.subr.mxu0 %v491_v15 }
 0x12b   :  { %703 = vmatpush3.msra.mxu1 %v443_v16  ;;  %738 = vmatpush3.msra.mxu0 %v475_v17 }
 0x12c   :  { %704 = vmatprep.subr.mxu1 %v458_v18  ;;  %739 = vmatprep.subr.mxu0 %v490_v19 }
 0x12d   :  { %705 = vmatpush3.msra.mxu1 %v442_v20  ;;  %740 = vmatpush3.msra.mxu0 %v474_v21 }
 0x12e   :  { %706 = vmatprep.subr.mxu1 %v457_v22  ;;  %741 = vmatprep.subr.mxu0 %v489_v23 }
 0x12f   :  { %707 = vmatpush3.msra.mxu1 %v441_v24  ;;  %742 = vmatpush3.msra.mxu0 %v473_v25 }
 0x130   :  { %708 = vmatprep.subr.mxu1 %v456_v26  ;;  %743 = vmatprep.subr.mxu0 %v488_v27 }
 0x131   :  { %709 = vmatpush3.msra.mxu1 %v440_v28  ;;  %744 = vmatpush3.msra.mxu0 %v472_v29 }
 0x132   :  { %710 = vmatprep.subr.mxu1 %v455_v30  ;;  %745 = vmatprep.subr.mxu0 %v487_v31 }
 0x133   :  { %711 = vmatpush3.msra.mxu1 %v439_v32  ;;  %746 = vmatpush3.msra.mxu0 %v471_v33 }
 0x1d4   :  { %v359_v45 = vpop.f32.mrf.mxu1  ;;  %v430_v46 = vpop.f32.mrf.mxu0 }
 0x1d5   :  { %v360_v47 = vadd.f32 %v359_v45, %v276_v41  ;;  %v431_v48 = vadd.f32 %v430_v46, %v284_v42 }
 0x1d6   :  { %v361_v49 = vpop.f32.mrf.mxu1  ;;  %v432_v50 = vpop.f32.mrf.mxu0 }
 0x1d7   :  { %v362_v51 = vadd.f32 %v361_v49, %v280_v43  ;;  %v433_v52 = vadd.f32 %v432_v50, %v288_v44  ;;  %v435_v55 = vmax.f32 %v360_v47, 0.0  ;;  %v437_v56 = vmax.f32 %v431_v48, 0.0 }
 0x1d9   :  { %v436_v53 = vmax.f32 %v362_v51, 0.0  ;;  %v438_v54 = vmax.f32 %v433_v52, 0.0 }
 0x1db   :  { %574 = vmatprep.mubr.f32.mxu1 %v436_v53  ;;  %644 = vmatprep.mubr.f32.mxu0 %v438_v54 }
 0x1dc   :  { %575 = vmatmul.mubr.f32.vlgmr.msra.gmra.mxu1 %v435_v55  ;;  %645 = vmatmul.mubr.f32.vlgmr.msra.gmra.mxu0 %v437_v56 }
 0x29c   :  { %v712_v57 = vpop.f32.mrf.mxu1  ;;  %v747_v58 = vpop.f32.mrf.mxu0 }
 0x29e   :  { %v713_v60 = vpop.f32.mrf.mxu1  ;;  %v748_v61 = vpop.f32.mrf.mxu0 }
 0x29f   :  { %v714_v62 = vadd.f32 %v713_v60, %v712_v57  ;;  %v749_v1 = vadd.f32 %v748_v61, %v747_v58 }
 0x2a1   :  { %v577_v63 = vadd.f32 %v714_v62, %v670_v59 }
 0x2a3   :  { %v647_v2 = vadd.f32 %v749_v1, %v577_v63 }
 0x2a5   :  { %650 = vst [vmem:[#allocation11] sm:$0x3] %v647_v2 }
 0x2a6   :  { %871 = shalt.err (!%p868_p10)
}
 0x2a7   :  { %660 = dma.vmem_to_hbm [thread:$0]  %s658_s26, 32, %s996_s7, [#allocation5]  }
 0x2a8   :  { %886 = dma.done.wait [#allocation5], 32  }
 0x2a9   :  { %887 = vsyncadd [#allocation5], 4294967264 }
 0x2aa   :  { %664 = vsyncpa [#allocation4], 1 }
 0x2ab   :  { %665 = vsyncpa [#allocation7], 1 }
 0x2ac   :  { %666 = vsyncpa [#allocation10], 1 }
 0x2ad   :  { %667 = vsyncpa [#allocation5], 1 }

</bundles_post_ra>
